<compile_context>
chip_gen: v7x
topology: tpu7x:2x2x1
jax: 0.10.0
libtpu: 0.0.40
codegen_flags: <defaults>
</compile_context>

<pallas_src>
import functools
import math

import jax
import jax.numpy as jnp
from jax.experimental import pallas as pl
from jax.experimental.pallas import tpu as pltpu


# ----------------------------------------------------------------------------- config
VOCAB_SIZE = 100
HIDDEN = 32
NUM_LAYERS = 2
NUM_HEADS = 2
HEAD_DIM = HIDDEN // NUM_HEADS
INTERMEDIATE = 64
MAX_POS = 32
PAD_IDX = 1          # RoBERTa padding_idx
LN_EPS = 1e-5
NUM_CLASSES = 3

FC1_PAD = 384        # 300 padded to a 128-lane multiple (zero pad, exact under ReLU)
FC2_PAD = 128        # 100 padded to 128
FC3_PAD = 128        # 3 padded to 128 (lane-dense output store)

SLAB_W = FC1_PAD     # column width of both packed parameter slabs

# weight-slab row layout (per layer: wqkv 32 | wo 32 | wi 32 | wo2 64 rows)
ENC_ROWS_PER_LAYER = 3 * HIDDEN + INTERMEDIATE          # 160
HEAD_ROW_BASE = NUM_LAYERS * ENC_ROWS_PER_LAYER         # 320

# vector-slab row layout
VEC_EMB_G, VEC_EMB_B = 0, 1
VEC_LAYER_BASE = 2
VEC_ROWS_PER_LAYER = 8
V_BQKV, V_BO, V_LN1G, V_LN1B, V_BI, V_BO2, V_LN2G, V_LN2B = range(8)
VEC_FC1B = VEC_LAYER_BASE + NUM_LAYERS * VEC_ROWS_PER_LAYER   # 18
VEC_FC2B = VEC_FC1B + 1
VEC_FC3B = VEC_FC1B + 2

BATCH = 2
SEQ = 8

_VMEM = pl.BlockSpec(memory_space=pltpu.MemorySpace.VMEM)


# ----------------------------------------------------------------------------- fused kernel
def _bert_forward_kernel(emb_ref, amask_ref, vec_ref, w_ref, out_ref,
                         *, batch, seq, num_layers, num_heads, head_dim):
    hidden = num_heads * head_dim
    inter = INTERMEDIATE

    def vrow(r, w):
        # one packed parameter row -> (1, w) f32, broadcasts over rows
        return vec_ref[r:r + 1, 0:w]

    def layernorm(x, g, b):
        mean = jnp.mean(x, axis=-1, keepdims=True)
        var = jnp.mean((x - mean) ** 2, axis=-1, keepdims=True)
        return (x - mean) * jax.lax.rsqrt(var + LN_EPS) * g + b

    def bf(x):
        return x.astype(jnp.bfloat16)

    amask = amask_ref[...]                               # (B, 1, S) additive 0 / -1e9

    # --- embedding LayerNorm ---------------------------------------------------
    h = layernorm(emb_ref[...], vrow(VEC_EMB_G, hidden), vrow(VEC_EMB_B, hidden))

    # --- encoder layers (static Python loop, weights sliced out of one slab) ---
    for li in range(num_layers):
        lw = li * ENC_ROWS_PER_LAYER
        lv = VEC_LAYER_BASE + li * VEC_ROWS_PER_LAYER

        # fused QKV projection (1/sqrt(d) already folded into the Q columns)
        qkv = jnp.dot(bf(h), w_ref[lw:lw + hidden, 0:3 * hidden],
                      preferred_element_type=jnp.float32) + vrow(lv + V_BQKV, 3 * hidden)

        # attention: batched over B per head; each head is folded straight into
        # the output projection via a sublane row-slice of Wo (no lane concats).
        attn = None
        for hd in range(num_heads):
            c0 = hd * head_dim
            q3 = qkv[:, c0:c0 + head_dim].reshape(batch, seq, head_dim)
            k3 = qkv[:, hidden + c0:hidden + c0 + head_dim].reshape(batch, seq, head_dim)
            v3 = qkv[:, 2 * hidden + c0:2 * hidden + c0 + head_dim].reshape(batch, seq, head_dim)

            s = jnp.einsum('bqd,bkd->bqk', bf(q3), bf(k3),
                           preferred_element_type=jnp.float32)          # (B, S, S)
            s = s + amask
            s = s - jnp.max(s, axis=-1, keepdims=True)
            p = jnp.exp(s)
            p = p * pl.reciprocal(jnp.sum(p, axis=-1, keepdims=True), approx=True)

            ctx = jnp.einsum('bqk,bkd->bqd', bf(p), bf(v3),
                             preferred_element_type=jnp.float32)        # (B, S, D)
            ctx = ctx.reshape(batch * seq, head_dim)

            wo_rows = w_ref[lw + hidden + c0: lw + hidden + c0 + head_dim, 0:hidden]
            part = jnp.dot(bf(ctx), wo_rows, preferred_element_type=jnp.float32)
            attn = part if attn is None else attn + part

        attn = attn + vrow(lv + V_BO, hidden)
        h = layernorm(attn + h, vrow(lv + V_LN1G, hidden), vrow(lv + V_LN1B, hidden))

        # FFN: GELU (exact, erf) then down-projection
        f = jnp.dot(bf(h), w_ref[lw + 2 * hidden: lw + 3 * hidden, 0:inter],
                    preferred_element_type=jnp.float32) + vrow(lv + V_BI, inter)
        f = 0.5 * f * (1.0 + jax.lax.erf(f * (1.0 / math.sqrt(2.0))))
        f = jnp.dot(bf(f), w_ref[lw + 3 * hidden: lw + 3 * hidden + inter, 0:hidden],
                    preferred_element_type=jnp.float32) + vrow(lv + V_BO2, hidden)
        h = layernorm(f + h, vrow(lv + V_LN2G, hidden), vrow(lv + V_LN2B, hidden))

    # --- classifier head on ALL rows (CLS rows selected in the wrapper) --------
    hb = HEAD_ROW_BASE
    x = jnp.dot(bf(h), w_ref[hb:hb + hidden, 0:FC1_PAD],
                preferred_element_type=jnp.float32) + vrow(VEC_FC1B, FC1_PAD)
    x = jnp.maximum(x, 0.0)
    x = jnp.dot(bf(x), w_ref[hb + hidden: hb + hidden + FC1_PAD, 0:FC2_PAD],
                preferred_element_type=jnp.float32) + vrow(VEC_FC2B, FC2_PAD)
    x = jnp.maximum(x, 0.0)
    out_ref[...] = (jnp.dot(bf(x),
                            w_ref[hb + hidden + FC1_PAD: hb + hidden + FC1_PAD + FC2_PAD,
                                  0:FC3_PAD],
                            preferred_element_type=jnp.float32)
                    + vrow(VEC_FC3B, FC3_PAD))


# ----------------------------------------------------------------------------- params
def init_params(key):
    def dense(k, fan_in, fan_out):
        kw, _ = jax.random.split(k)
        w = jax.random.normal(kw, (fan_in, fan_out), jnp.float32) * 0.02
        b = jnp.zeros((fan_out,), jnp.float32)
        return w, b

    keys = jax.random.split(key, 8 + NUM_LAYERS)
    p = {}
    p["word_emb"] = jax.random.normal(keys[0], (VOCAB_SIZE, HIDDEN), jnp.float32) * 0.02
    p["pos_emb"] = jax.random.normal(keys[1], (MAX_POS, HIDDEN), jnp.float32) * 0.02
    p["type_emb"] = jax.random.normal(keys[2], (1, HIDDEN), jnp.float32) * 0.02
    p["emb_ln_g"] = jnp.ones((HIDDEN,), jnp.float32)
    p["emb_ln_b"] = jnp.zeros((HIDDEN,), jnp.float32)

    p["layers"] = []
    for li in range(NUM_LAYERS):
        lk = jax.random.split(keys[8 + li], 6)
        p["layers"].append({
            "wq": dense(lk[0], HIDDEN, HIDDEN),
            "wk": dense(lk[1], HIDDEN, HIDDEN),
            "wv": dense(lk[2], HIDDEN, HIDDEN),
            "wo": dense(lk[3], HIDDEN, HIDDEN),
            "attn_ln_g": jnp.ones((HIDDEN,), jnp.float32),
            "attn_ln_b": jnp.zeros((HIDDEN,), jnp.float32),
            "wi": dense(lk[4], HIDDEN, INTERMEDIATE),
            "wo2": dense(lk[5], INTERMEDIATE, HIDDEN),
            "out_ln_g": jnp.ones((HIDDEN,), jnp.float32),
            "out_ln_b": jnp.zeros((HIDDEN,), jnp.float32),
        })

    p["fc1"] = dense(keys[3], HIDDEN, 300)
    p["fc2"] = dense(keys[4], 300, 100)
    p["fc3"] = dense(keys[5], 100, NUM_CLASSES)
    return p


def pack_params(p):
    """One-time packing: 1-row params -> one f32 slab, matmul weights -> one bf16 slab."""
    width = SLAB_W
    scale = 1.0 / math.sqrt(HEAD_DIM)

    def row(v):
        v = jnp.asarray(v, jnp.float32).reshape(-1)
        return jnp.pad(v, (0, width - v.shape[0]))

    def block(w):
        w = jnp.asarray(w, jnp.float32)
        return jnp.pad(w, ((0, 0), (0, width - w.shape[1])))

    vec_rows = [row(p["emb_ln_g"]), row(p["emb_ln_b"])]
    w_blocks = []
    for l in p["layers"]:
        (wq, bq), (wk, bk), (wv, bv) = l["wq"], l["wk"], l["wv"]
        # fused QKV with 1/sqrt(head_dim) folded into the Q columns
        wqkv = jnp.concatenate([wq * scale, wk, wv], axis=1)     # (H, 3H)
        bqkv = jnp.concatenate([bq * scale, bk, bv], axis=0)     # (3H,)
        vec_rows += [row(bqkv), row(l["wo"][1]),
                     row(l["attn_ln_g"]), row(l["attn_ln_b"]),
                     row(l["wi"][1]), row(l["wo2"][1]),
                     row(l["out_ln_g"]), row(l["out_ln_b"])]
        w_blocks += [block(wqkv), block(l["wo"][0]), block(l["wi"][0]), block(l["wo2"][0])]

    fc1_w, fc1_b = p["fc1"]
    fc2_w, fc2_b = p["fc2"]
    fc3_w, fc3_b = p["fc3"]
    # zero-pad head to lane-dense widths (exact: padded biases are zero, padded
    # weight rows downstream are zero, and ReLU(0) = 0).
    fc1_w = jnp.pad(fc1_w, ((0, 0), (0, FC1_PAD - fc1_w.shape[1])))
    fc2_w = jnp.pad(fc2_w, ((0, FC1_PAD - fc2_w.shape[0]), (0, FC2_PAD - fc2_w.shape[1])))
    fc3_w = jnp.pad(fc3_w, ((0, FC2_PAD - fc3_w.shape[0]), (0, FC3_PAD - fc3_w.shape[1])))
    w_blocks += [block(fc1_w), block(fc2_w), block(fc3_w)]
    vec_rows += [row(fc1_b), row(fc2_b), row(fc3_b)]

    return {
        "word_emb": p["word_emb"],
        "pos_emb": p["pos_emb"],
        "type_emb": p["type_emb"],
        "vecs": jnp.stack(vec_rows, axis=0),                              # (21, 384) f32
        "wslab": jnp.concatenate(w_blocks, axis=0).astype(jnp.bfloat16),  # (864, 384) bf16
    }


# ----------------------------------------------------------------------------- forward
def bert_classifier_forward(packed, input_ids, attention_mask):
    b, s = input_ids.shape
    mask_f = attention_mask.astype(jnp.float32)

    # --- embeddings (gather is glue) -------------------------------------------
    # RoBERTa position ids: padding_idx + cumulative count of non-pad tokens.
    not_pad = (input_ids != PAD_IDX).astype(jnp.int32)
    position_ids = jnp.cumsum(not_pad, axis=1) * not_pad + PAD_IDX
    word_e = jnp.take(packed["word_emb"], input_ids, axis=0)
    pos_e = jnp.take(packed["pos_emb"], position_ids, axis=0)
    type_e = packed["type_emb"][0][None, None, :]
    emb = (word_e + pos_e + type_e).reshape(b * s, HIDDEN)

    # additive attention mask (B, 1, S): 0 where attended, -1e9 where padded
    amask = ((1.0 - mask_f) * (-1e9)).reshape(b, 1, s)

    kernel = functools.partial(
        _bert_forward_kernel,
        batch=b, seq=s, num_layers=NUM_LAYERS,
        num_heads=NUM_HEADS, head_dim=HEAD_DIM)

    out = pl.pallas_call(
        kernel,
        out_shape=jax.ShapeDtypeStruct((b * s, FC3_PAD), jnp.float32),
        in_specs=[_VMEM] * 4,
        out_specs=_VMEM,
    )(emb, amask, packed["vecs"], packed["wslab"])

    # select CLS rows and the real (unpadded) logits
    return out.reshape(b, s, FC3_PAD)[:, 0, :NUM_CLASSES]


# ----------------------------------------------------------------------------- main
if __name__ == "__main__":
    key = jax.random.PRNGKey(0)
    k_ids, k_params = jax.random.split(key)

    # batch=2, seq=8; second sequence has 2 padding tokens at the end.
    input_ids = jax.random.randint(k_ids, (BATCH, SEQ), 2, VOCAB_SIZE, dtype=jnp.int32)
    attention_mask = jnp.ones((BATCH, SEQ), jnp.int32)
    attention_mask = attention_mask.at[1, 6:].set(0)
    input_ids = jnp.where(attention_mask == 0, PAD_IDX, input_ids)

    params = init_params(k_params)
    packed = pack_params(params)

    logits = bert_classifier_forward(packed, input_ids, attention_mask)
    jax.block_until_ready(logits)
    assert logits.shape == (BATCH, NUM_CLASSES)
    print("KERNEL_OK")
</pallas_src>

<mosaic_0001>
module attributes {stable_mosaic.version = 11 : i64} {
  func.func @_bert_forward_kernel(%arg0: memref<16x32xf32, #tpu.memory_space<vmem>>, %arg1: memref<2x1x8xf32, #tpu.memory_space<vmem>>, %arg2: memref<21x384xf32, #tpu.memory_space<vmem>>, %arg3: memref<864x384xbf16, #tpu.memory_space<vmem>>, %arg4: memref<16x128xf32, #tpu.memory_space<vmem>>) attributes {dimension_semantics = [], scalar_prefetch = 0 : i64, scratch_operands = 0 : i64, tpu.core_type = #tpu.core_type<tc>} {
    %c0 = arith.constant 0 : index
    %c0_0 = arith.constant 0 : index
    %c0_1 = arith.constant 0 : index
    %0 = vector.load %arg1[%c0, %c0_0, %c0_1] : memref<2x1x8xf32, #tpu.memory_space<vmem>>, vector<2x1x8xf32>
    %c0_2 = arith.constant 0 : index
    %c0_3 = arith.constant 0 : index
    %1 = vector.load %arg0[%c0_2, %c0_3] : memref<16x32xf32, #tpu.memory_space<vmem>>, vector<16x32xf32>
    %c0_4 = arith.constant 0 : index
    %c0_5 = arith.constant 0 : index
    %2 = vector.load %arg2[%c0_4, %c0_5] : memref<21x384xf32, #tpu.memory_space<vmem>>, vector<1x32xf32>
    %c1 = arith.constant 1 : index
    %c0_6 = arith.constant 0 : index
    %3 = vector.load %arg2[%c1, %c0_6] : memref<21x384xf32, #tpu.memory_space<vmem>>, vector<1x32xf32>
    %cst = arith.constant dense<0.000000e+00> : vector<16xf32>
    %4 = vector.multi_reduction <add>, %1, %cst [1] : vector<16x32xf32> to vector<16xf32>
    %5 = vector.shape_cast %4 : vector<16xf32> to vector<16x1xf32>
    %cst_7 = arith.constant 3.200000e+01 : f32
    %6 = vector.broadcast %cst_7 : f32 to vector<16x1xf32>
    %7 = arith.divf %5, %6 : vector<16x1xf32>
    %8 = vector.broadcast %7 : vector<16x1xf32> to vector<16x32xf32>
    %9 = arith.subf %1, %8 : vector<16x32xf32>
    %10 = arith.mulf %9, %9 : vector<16x32xf32>
    %cst_8 = arith.constant dense<0.000000e+00> : vector<16xf32>
    %11 = vector.multi_reduction <add>, %10, %cst_8 [1] : vector<16x32xf32> to vector<16xf32>
    %12 = vector.shape_cast %11 : vector<16xf32> to vector<16x1xf32>
    %cst_9 = arith.constant 3.200000e+01 : f32
    %13 = vector.broadcast %cst_9 : f32 to vector<16x1xf32>
    %14 = arith.divf %12, %13 : vector<16x1xf32>
    %15 = vector.broadcast %7 : vector<16x1xf32> to vector<16x32xf32>
    %16 = arith.subf %1, %15 : vector<16x32xf32>
    %cst_10 = arith.constant 9.99999974E-6 : f32
    %17 = vector.broadcast %cst_10 : f32 to vector<16x1xf32>
    %18 = arith.addf %14, %17 : vector<16x1xf32>
    %19 = math.rsqrt %18 : vector<16x1xf32>
    %20 = vector.broadcast %19 : vector<16x1xf32> to vector<16x32xf32>
    %21 = arith.mulf %16, %20 : vector<16x32xf32>
    %22 = vector.broadcast %2 : vector<1x32xf32> to vector<16x32xf32>
    %23 = arith.mulf %21, %22 : vector<16x32xf32>
    %24 = vector.broadcast %3 : vector<1x32xf32> to vector<16x32xf32>
    %25 = arith.addf %23, %24 : vector<16x32xf32>
    %26 = arith.truncf %25 : vector<16x32xf32> to vector<16x32xbf16>
    %c0_11 = arith.constant 0 : index
    %c0_12 = arith.constant 0 : index
    %27 = vector.load %arg3[%c0_11, %c0_12] : memref<864x384xbf16, #tpu.memory_space<vmem>>, vector<32x96xbf16>
    %cst_13 = arith.constant dense<0.000000e+00> : vector<16x96xf32>
    %28 = tpu.matmul %26, %27, %cst_13 {dimension_numbers = #tpu.dot_dimension_numbers<[1], [0], [0], [1], [0, 0, 1, 1], [], []>} : vector<16x32xbf16>, vector<32x96xbf16>, vector<16x96xf32> -> vector<16x96xf32>
    %c2 = arith.constant 2 : index
    %c0_14 = arith.constant 0 : index
    %29 = vector.load %arg2[%c2, %c0_14] : memref<21x384xf32, #tpu.memory_space<vmem>>, vector<1x96xf32>
    %30 = vector.broadcast %29 : vector<1x96xf32> to vector<16x96xf32>
    %31 = arith.addf %28, %30 : vector<16x96xf32>
    %32 = vector.extract_strided_slice %31 {offsets = [0, 0], sizes = [16, 16], strides = [1, 1]} : vector<16x96xf32> to vector<16x16xf32>
    %33 = vector.shape_cast %32 : vector<16x16xf32> to vector<2x8x16xf32>
    %34 = vector.extract_strided_slice %31 {offsets = [0, 32], sizes = [16, 16], strides = [1, 1]} : vector<16x96xf32> to vector<16x16xf32>
    %35 = vector.shape_cast %34 : vector<16x16xf32> to vector<2x8x16xf32>
    %36 = vector.extract_strided_slice %31 {offsets = [0, 64], sizes = [16, 16], strides = [1, 1]} : vector<16x96xf32> to vector<16x16xf32>
    %37 = vector.shape_cast %36 : vector<16x16xf32> to vector<2x8x16xf32>
    %38 = arith.truncf %33 : vector<2x8x16xf32> to vector<2x8x16xbf16>
    %39 = arith.truncf %35 : vector<2x8x16xf32> to vector<2x8x16xbf16>
    "tpu.trace_start"() <{level = 10 : i32, message = "bqd,bkd->bqk"}> : () -> ()
    %cst_15 = arith.constant dense<0.000000e+00> : vector<2x8x8xf32>
    %40 = tpu.matmul %38, %39, %cst_15 {dimension_numbers = #tpu.dot_dimension_numbers<[2], [2], [1], [1], [0, 0, 0, 1, 1, 1], [0], [0]>} : vector<2x8x16xbf16>, vector<2x8x16xbf16>, vector<2x8x8xf32> -> vector<2x8x8xf32>
    "tpu.trace_stop"() : () -> ()
    %41 = vector.broadcast %0 : vector<2x1x8xf32> to vector<2x8x8xf32>
    %42 = arith.addf %40, %41 : vector<2x8x8xf32>
    %cst_16 = arith.constant dense<0xFF800000> : vector<2x8xf32>
    %43 = vector.multi_reduction <maximumf>, %42, %cst_16 [2] : vector<2x8x8xf32> to vector<2x8xf32>
    %44 = vector.shape_cast %43 : vector<2x8xf32> to vector<2x8x1xf32>
    %45 = vector.broadcast %44 : vector<2x8x1xf32> to vector<2x8x8xf32>
    %46 = arith.subf %42, %45 : vector<2x8x8xf32>
    %47 = math.exp %46 : vector<2x8x8xf32>
    %cst_17 = arith.constant dense<0.000000e+00> : vector<2x8xf32>
    %48 = vector.multi_reduction <add>, %47, %cst_17 [2] : vector<2x8x8xf32> to vector<2x8xf32>
    %49 = vector.shape_cast %48 : vector<2x8xf32> to vector<2x8x1xf32>
    %50 = tpu.reciprocal %49 {approx = true} : vector<2x8x1xf32> -> vector<2x8x1xf32>
    %51 = vector.broadcast %50 : vector<2x8x1xf32> to vector<2x8x8xf32>
    %52 = arith.mulf %47, %51 : vector<2x8x8xf32>
    %53 = arith.truncf %52 : vector<2x8x8xf32> to vector<2x8x8xbf16>
    %54 = arith.truncf %37 : vector<2x8x16xf32> to vector<2x8x16xbf16>
    "tpu.trace_start"() <{level = 10 : i32, message = "bqk,bkd->bqd"}> : () -> ()
    %cst_18 = arith.constant dense<0.000000e+00> : vector<2x8x16xf32>
    %55 = tpu.matmul %53, %54, %cst_18 {dimension_numbers = #tpu.dot_dimension_numbers<[2], [1], [1], [2], [0, 0, 0, 1, 1, 2], [0], [0]>} : vector<2x8x8xbf16>, vector<2x8x16xbf16>, vector<2x8x16xf32> -> vector<2x8x16xf32>
    "tpu.trace_stop"() : () -> ()
    %56 = vector.shape_cast %55 : vector<2x8x16xf32> to vector<16x16xf32>
    %c32 = arith.constant 32 : index
    %c0_19 = arith.constant 0 : index
    %57 = vector.load %arg3[%c32, %c0_19] : memref<864x384xbf16, #tpu.memory_space<vmem>>, vector<16x32xbf16>
    %58 = arith.truncf %56 : vector<16x16xf32> to vector<16x16xbf16>
    %cst_20 = arith.constant dense<0.000000e+00> : vector<16x32xf32>
    %59 = tpu.matmul %58, %57, %cst_20 {dimension_numbers = #tpu.dot_dimension_numbers<[1], [0], [0], [1], [0, 0, 1, 1], [], []>} : vector<16x16xbf16>, vector<16x32xbf16>, vector<16x32xf32> -> vector<16x32xf32>
    %60 = vector.extract_strided_slice %31 {offsets = [0, 16], sizes = [16, 16], strides = [1, 1]} : vector<16x96xf32> to vector<16x16xf32>
    %61 = vector.shape_cast %60 : vector<16x16xf32> to vector<2x8x16xf32>
    %62 = vector.extract_strided_slice %31 {offsets = [0, 48], sizes = [16, 16], strides = [1, 1]} : vector<16x96xf32> to vector<16x16xf32>
    %63 = vector.shape_cast %62 : vector<16x16xf32> to vector<2x8x16xf32>
    %64 = vector.extract_strided_slice %31 {offsets = [0, 80], sizes = [16, 16], strides = [1, 1]} : vector<16x96xf32> to vector<16x16xf32>
    %65 = vector.shape_cast %64 : vector<16x16xf32> to vector<2x8x16xf32>
    %66 = arith.truncf %61 : vector<2x8x16xf32> to vector<2x8x16xbf16>
    %67 = arith.truncf %63 : vector<2x8x16xf32> to vector<2x8x16xbf16>
    "tpu.trace_start"() <{level = 10 : i32, message = "bqd,bkd->bqk"}> : () -> ()
    %cst_21 = arith.constant dense<0.000000e+00> : vector<2x8x8xf32>
    %68 = tpu.matmul %66, %67, %cst_21 {dimension_numbers = #tpu.dot_dimension_numbers<[2], [2], [1], [1], [0, 0, 0, 1, 1, 1], [0], [0]>} : vector<2x8x16xbf16>, vector<2x8x16xbf16>, vector<2x8x8xf32> -> vector<2x8x8xf32>
    "tpu.trace_stop"() : () -> ()
    %69 = vector.broadcast %0 : vector<2x1x8xf32> to vector<2x8x8xf32>
    %70 = arith.addf %68, %69 : vector<2x8x8xf32>
    %cst_22 = arith.constant dense<0xFF800000> : vector<2x8xf32>
    %71 = vector.multi_reduction <maximumf>, %70, %cst_22 [2] : vector<2x8x8xf32> to vector<2x8xf32>
    %72 = vector.shape_cast %71 : vector<2x8xf32> to vector<2x8x1xf32>
    %73 = vector.broadcast %72 : vector<2x8x1xf32> to vector<2x8x8xf32>
    %74 = arith.subf %70, %73 : vector<2x8x8xf32>
    %75 = math.exp %74 : vector<2x8x8xf32>
    %cst_23 = arith.constant dense<0.000000e+00> : vector<2x8xf32>
    %76 = vector.multi_reduction <add>, %75, %cst_23 [2] : vector<2x8x8xf32> to vector<2x8xf32>
    %77 = vector.shape_cast %76 : vector<2x8xf32> to vector<2x8x1xf32>
    %78 = tpu.reciprocal %77 {approx = true} : vector<2x8x1xf32> -> vector<2x8x1xf32>
    %79 = vector.broadcast %78 : vector<2x8x1xf32> to vector<2x8x8xf32>
    %80 = arith.mulf %75, %79 : vector<2x8x8xf32>
    %81 = arith.truncf %80 : vector<2x8x8xf32> to vector<2x8x8xbf16>
    %82 = arith.truncf %65 : vector<2x8x16xf32> to vector<2x8x16xbf16>
    "tpu.trace_start"() <{level = 10 : i32, message = "bqk,bkd->bqd"}> : () -> ()
    %cst_24 = arith.constant dense<0.000000e+00> : vector<2x8x16xf32>
    %83 = tpu.matmul %81, %82, %cst_24 {dimension_numbers = #tpu.dot_dimension_numbers<[2], [1], [1], [2], [0, 0, 0, 1, 1, 2], [0], [0]>} : vector<2x8x8xbf16>, vector<2x8x16xbf16>, vector<2x8x16xf32> -> vector<2x8x16xf32>
    "tpu.trace_stop"() : () -> ()
    %84 = vector.shape_cast %83 : vector<2x8x16xf32> to vector<16x16xf32>
    %c48 = arith.constant 48 : index
    %c0_25 = arith.constant 0 : index
    %85 = vector.load %arg3[%c48, %c0_25] : memref<864x384xbf16, #tpu.memory_space<vmem>>, vector<16x32xbf16>
    %86 = arith.truncf %84 : vector<16x16xf32> to vector<16x16xbf16>
    %cst_26 = arith.constant dense<0.000000e+00> : vector<16x32xf32>
    %87 = tpu.matmul %86, %85, %cst_26 {dimension_numbers = #tpu.dot_dimension_numbers<[1], [0], [0], [1], [0, 0, 1, 1], [], []>} : vector<16x16xbf16>, vector<16x32xbf16>, vector<16x32xf32> -> vector<16x32xf32>
    %88 = arith.addf %59, %87 : vector<16x32xf32>
    %c3 = arith.constant 3 : index
    %c0_27 = arith.constant 0 : index
    %89 = vector.load %arg2[%c3, %c0_27] : memref<21x384xf32, #tpu.memory_space<vmem>>, vector<1x32xf32>
    %90 = vector.broadcast %89 : vector<1x32xf32> to vector<16x32xf32>
    %91 = arith.addf %88, %90 : vector<16x32xf32>
    %92 = arith.addf %91, %25 : vector<16x32xf32>
    %c4 = arith.constant 4 : index
    %c0_28 = arith.constant 0 : index
    %93 = vector.load %arg2[%c4, %c0_28] : memref<21x384xf32, #tpu.memory_space<vmem>>, vector<1x32xf32>
    %c5 = arith.constant 5 : index
    %c0_29 = arith.constant 0 : index
    %94 = vector.load %arg2[%c5, %c0_29] : memref<21x384xf32, #tpu.memory_space<vmem>>, vector<1x32xf32>
    %cst_30 = arith.constant dense<0.000000e+00> : vector<16xf32>
    %95 = vector.multi_reduction <add>, %92, %cst_30 [1] : vector<16x32xf32> to vector<16xf32>
    %96 = vector.shape_cast %95 : vector<16xf32> to vector<16x1xf32>
    %cst_31 = arith.constant 3.200000e+01 : f32
    %97 = vector.broadcast %cst_31 : f32 to vector<16x1xf32>
    %98 = arith.divf %96, %97 : vector<16x1xf32>
    %99 = vector.broadcast %98 : vector<16x1xf32> to vector<16x32xf32>
    %100 = arith.subf %92, %99 : vector<16x32xf32>
    %101 = arith.mulf %100, %100 : vector<16x32xf32>
    %cst_32 = arith.constant dense<0.000000e+00> : vector<16xf32>
    %102 = vector.multi_reduction <add>, %101, %cst_32 [1] : vector<16x32xf32> to vector<16xf32>
    %103 = vector.shape_cast %102 : vector<16xf32> to vector<16x1xf32>
    %cst_33 = arith.constant 3.200000e+01 : f32
    %104 = vector.broadcast %cst_33 : f32 to vector<16x1xf32>
    %105 = arith.divf %103, %104 : vector<16x1xf32>
    %106 = vector.broadcast %98 : vector<16x1xf32> to vector<16x32xf32>
    %107 = arith.subf %92, %106 : vector<16x32xf32>
    %cst_34 = arith.constant 9.99999974E-6 : f32
    %108 = vector.broadcast %cst_34 : f32 to vector<16x1xf32>
    %109 = arith.addf %105, %108 : vector<16x1xf32>
    %110 = math.rsqrt %109 : vector<16x1xf32>
    %111 = vector.broadcast %110 : vector<16x1xf32> to vector<16x32xf32>
    %112 = arith.mulf %107, %111 : vector<16x32xf32>
    %113 = vector.broadcast %93 : vector<1x32xf32> to vector<16x32xf32>
    %114 = arith.mulf %112, %113 : vector<16x32xf32>
    %115 = vector.broadcast %94 : vector<1x32xf32> to vector<16x32xf32>
    %116 = arith.addf %114, %115 : vector<16x32xf32>
    %117 = arith.truncf %116 : vector<16x32xf32> to vector<16x32xbf16>
    %c64 = arith.constant 64 : index
    %c0_35 = arith.constant 0 : index
    %118 = vector.load %arg3[%c64, %c0_35] : memref<864x384xbf16, #tpu.memory_space<vmem>>, vector<32x64xbf16>
    %cst_36 = arith.constant dense<0.000000e+00> : vector<16x64xf32>
    %119 = tpu.matmul %117, %118, %cst_36 {dimension_numbers = #tpu.dot_dimension_numbers<[1], [0], [0], [1], [0, 0, 1, 1], [], []>} : vector<16x32xbf16>, vector<32x64xbf16>, vector<16x64xf32> -> vector<16x64xf32>
    %c6 = arith.constant 6 : index
    %c0_37 = arith.constant 0 : index
    %120 = vector.load %arg2[%c6, %c0_37] : memref<21x384xf32, #tpu.memory_space<vmem>>, vector<1x64xf32>
    %121 = vector.broadcast %120 : vector<1x64xf32> to vector<16x64xf32>
    %122 = arith.addf %119, %121 : vector<16x64xf32>
    %cst_38 = arith.constant 5.000000e-01 : f32
    %123 = vector.broadcast %cst_38 : f32 to vector<16x64xf32>
    %124 = arith.mulf %123, %122 : vector<16x64xf32>
    %cst_39 = arith.constant 0.707106769 : f32
    %125 = vector.broadcast %cst_39 : f32 to vector<16x64xf32>
    %126 = arith.mulf %122, %125 : vector<16x64xf32>
    %127 = math.erf %126 : vector<16x64xf32>
    %cst_40 = arith.constant 1.000000e+00 : f32
    %128 = vector.broadcast %cst_40 : f32 to vector<16x64xf32>
    %129 = arith.addf %128, %127 : vector<16x64xf32>
    %130 = arith.mulf %124, %129 : vector<16x64xf32>
    %131 = arith.truncf %130 : vector<16x64xf32> to vector<16x64xbf16>
    %c96 = arith.constant 96 : index
    %c0_41 = arith.constant 0 : index
    %132 = vector.load %arg3[%c96, %c0_41] : memref<864x384xbf16, #tpu.memory_space<vmem>>, vector<64x32xbf16>
    %cst_42 = arith.constant dense<0.000000e+00> : vector<16x32xf32>
    %133 = tpu.matmul %131, %132, %cst_42 {dimension_numbers = #tpu.dot_dimension_numbers<[1], [0], [0], [1], [0, 0, 1, 1], [], []>} : vector<16x64xbf16>, vector<64x32xbf16>, vector<16x32xf32> -> vector<16x32xf32>
    %c7 = arith.constant 7 : index
    %c0_43 = arith.constant 0 : index
    %134 = vector.load %arg2[%c7, %c0_43] : memref<21x384xf32, #tpu.memory_space<vmem>>, vector<1x32xf32>
    %135 = vector.broadcast %134 : vector<1x32xf32> to vector<16x32xf32>
    %136 = arith.addf %133, %135 : vector<16x32xf32>
    %137 = arith.addf %136, %116 : vector<16x32xf32>
    %c8 = arith.constant 8 : index
    %c0_44 = arith.constant 0 : index
    %138 = vector.load %arg2[%c8, %c0_44] : memref<21x384xf32, #tpu.memory_space<vmem>>, vector<1x32xf32>
    %c9 = arith.constant 9 : index
    %c0_45 = arith.constant 0 : index
    %139 = vector.load %arg2[%c9, %c0_45] : memref<21x384xf32, #tpu.memory_space<vmem>>, vector<1x32xf32>
    %cst_46 = arith.constant dense<0.000000e+00> : vector<16xf32>
    %140 = vector.multi_reduction <add>, %137, %cst_46 [1] : vector<16x32xf32> to vector<16xf32>
    %141 = vector.shape_cast %140 : vector<16xf32> to vector<16x1xf32>
    %cst_47 = arith.constant 3.200000e+01 : f32
    %142 = vector.broadcast %cst_47 : f32 to vector<16x1xf32>
    %143 = arith.divf %141, %142 : vector<16x1xf32>
    %144 = vector.broadcast %143 : vector<16x1xf32> to vector<16x32xf32>
    %145 = arith.subf %137, %144 : vector<16x32xf32>
    %146 = arith.mulf %145, %145 : vector<16x32xf32>
    %cst_48 = arith.constant dense<0.000000e+00> : vector<16xf32>
    %147 = vector.multi_reduction <add>, %146, %cst_48 [1] : vector<16x32xf32> to vector<16xf32>
    %148 = vector.shape_cast %147 : vector<16xf32> to vector<16x1xf32>
    %cst_49 = arith.constant 3.200000e+01 : f32
    %149 = vector.broadcast %cst_49 : f32 to vector<16x1xf32>
    %150 = arith.divf %148, %149 : vector<16x1xf32>
    %151 = vector.broadcast %143 : vector<16x1xf32> to vector<16x32xf32>
    %152 = arith.subf %137, %151 : vector<16x32xf32>
    %cst_50 = arith.constant 9.99999974E-6 : f32
    %153 = vector.broadcast %cst_50 : f32 to vector<16x1xf32>
    %154 = arith.addf %150, %153 : vector<16x1xf32>
    %155 = math.rsqrt %154 : vector<16x1xf32>
    %156 = vector.broadcast %155 : vector<16x1xf32> to vector<16x32xf32>
    %157 = arith.mulf %152, %156 : vector<16x32xf32>
    %158 = vector.broadcast %138 : vector<1x32xf32> to vector<16x32xf32>
    %159 = arith.mulf %157, %158 : vector<16x32xf32>
    %160 = vector.broadcast %139 : vector<1x32xf32> to vector<16x32xf32>
    %161 = arith.addf %159, %160 : vector<16x32xf32>
    %162 = arith.truncf %161 : vector<16x32xf32> to vector<16x32xbf16>
    %c160 = arith.constant 160 : index
    %c0_51 = arith.constant 0 : index
    %163 = vector.load %arg3[%c160, %c0_51] : memref<864x384xbf16, #tpu.memory_space<vmem>>, vector<32x96xbf16>
    %cst_52 = arith.constant dense<0.000000e+00> : vector<16x96xf32>
    %164 = tpu.matmul %162, %163, %cst_52 {dimension_numbers = #tpu.dot_dimension_numbers<[1], [0], [0], [1], [0, 0, 1, 1], [], []>} : vector<16x32xbf16>, vector<32x96xbf16>, vector<16x96xf32> -> vector<16x96xf32>
    %c10 = arith.constant 10 : index
    %c0_53 = arith.constant 0 : index
    %165 = vector.load %arg2[%c10, %c0_53] : memref<21x384xf32, #tpu.memory_space<vmem>>, vector<1x96xf32>
    %166 = vector.broadcast %165 : vector<1x96xf32> to vector<16x96xf32>
    %167 = arith.addf %164, %166 : vector<16x96xf32>
    %168 = vector.extract_strided_slice %167 {offsets = [0, 0], sizes = [16, 16], strides = [1, 1]} : vector<16x96xf32> to vector<16x16xf32>
    %169 = vector.shape_cast %168 : vector<16x16xf32> to vector<2x8x16xf32>
    %170 = vector.extract_strided_slice %167 {offsets = [0, 32], sizes = [16, 16], strides = [1, 1]} : vector<16x96xf32> to vector<16x16xf32>
    %171 = vector.shape_cast %170 : vector<16x16xf32> to vector<2x8x16xf32>
    %172 = vector.extract_strided_slice %167 {offsets = [0, 64], sizes = [16, 16], strides = [1, 1]} : vector<16x96xf32> to vector<16x16xf32>
    %173 = vector.shape_cast %172 : vector<16x16xf32> to vector<2x8x16xf32>
    %174 = arith.truncf %169 : vector<2x8x16xf32> to vector<2x8x16xbf16>
    %175 = arith.truncf %171 : vector<2x8x16xf32> to vector<2x8x16xbf16>
    "tpu.trace_start"() <{level = 10 : i32, message = "bqd,bkd->bqk"}> : () -> ()
    %cst_54 = arith.constant dense<0.000000e+00> : vector<2x8x8xf32>
    %176 = tpu.matmul %174, %175, %cst_54 {dimension_numbers = #tpu.dot_dimension_numbers<[2], [2], [1], [1], [0, 0, 0, 1, 1, 1], [0], [0]>} : vector<2x8x16xbf16>, vector<2x8x16xbf16>, vector<2x8x8xf32> -> vector<2x8x8xf32>
    "tpu.trace_stop"() : () -> ()
    %177 = vector.broadcast %0 : vector<2x1x8xf32> to vector<2x8x8xf32>
    %178 = arith.addf %176, %177 : vector<2x8x8xf32>
    %cst_55 = arith.constant dense<0xFF800000> : vector<2x8xf32>
    %179 = vector.multi_reduction <maximumf>, %178, %cst_55 [2] : vector<2x8x8xf32> to vector<2x8xf32>
    %180 = vector.shape_cast %179 : vector<2x8xf32> to vector<2x8x1xf32>
    %181 = vector.broadcast %180 : vector<2x8x1xf32> to vector<2x8x8xf32>
    %182 = arith.subf %178, %181 : vector<2x8x8xf32>
    %183 = math.exp %182 : vector<2x8x8xf32>
    %cst_56 = arith.constant dense<0.000000e+00> : vector<2x8xf32>
    %184 = vector.multi_reduction <add>, %183, %cst_56 [2] : vector<2x8x8xf32> to vector<2x8xf32>
    %185 = vector.shape_cast %184 : vector<2x8xf32> to vector<2x8x1xf32>
    %186 = tpu.reciprocal %185 {approx = true} : vector<2x8x1xf32> -> vector<2x8x1xf32>
    %187 = vector.broadcast %186 : vector<2x8x1xf32> to vector<2x8x8xf32>
    %188 = arith.mulf %183, %187 : vector<2x8x8xf32>
    %189 = arith.truncf %188 : vector<2x8x8xf32> to vector<2x8x8xbf16>
    %190 = arith.truncf %173 : vector<2x8x16xf32> to vector<2x8x16xbf16>
    "tpu.trace_start"() <{level = 10 : i32, message = "bqk,bkd->bqd"}> : () -> ()
    %cst_57 = arith.constant dense<0.000000e+00> : vector<2x8x16xf32>
    %191 = tpu.matmul %189, %190, %cst_57 {dimension_numbers = #tpu.dot_dimension_numbers<[2], [1], [1], [2], [0, 0, 0, 1, 1, 2], [0], [0]>} : vector<2x8x8xbf16>, vector<2x8x16xbf16>, vector<2x8x16xf32> -> vector<2x8x16xf32>
    "tpu.trace_stop"() : () -> ()
    %192 = vector.shape_cast %191 : vector<2x8x16xf32> to vector<16x16xf32>
    %c192 = arith.constant 192 : index
    %c0_58 = arith.constant 0 : index
    %193 = vector.load %arg3[%c192, %c0_58] : memref<864x384xbf16, #tpu.memory_space<vmem>>, vector<16x32xbf16>
    %194 = arith.truncf %192 : vector<16x16xf32> to vector<16x16xbf16>
    %cst_59 = arith.constant dense<0.000000e+00> : vector<16x32xf32>
    %195 = tpu.matmul %194, %193, %cst_59 {dimension_numbers = #tpu.dot_dimension_numbers<[1], [0], [0], [1], [0, 0, 1, 1], [], []>} : vector<16x16xbf16>, vector<16x32xbf16>, vector<16x32xf32> -> vector<16x32xf32>
    %196 = vector.extract_strided_slice %167 {offsets = [0, 16], sizes = [16, 16], strides = [1, 1]} : vector<16x96xf32> to vector<16x16xf32>
    %197 = vector.shape_cast %196 : vector<16x16xf32> to vector<2x8x16xf32>
    %198 = vector.extract_strided_slice %167 {offsets = [0, 48], sizes = [16, 16], strides = [1, 1]} : vector<16x96xf32> to vector<16x16xf32>
    %199 = vector.shape_cast %198 : vector<16x16xf32> to vector<2x8x16xf32>
    %200 = vector.extract_strided_slice %167 {offsets = [0, 80], sizes = [16, 16], strides = [1, 1]} : vector<16x96xf32> to vector<16x16xf32>
    %201 = vector.shape_cast %200 : vector<16x16xf32> to vector<2x8x16xf32>
    %202 = arith.truncf %197 : vector<2x8x16xf32> to vector<2x8x16xbf16>
    %203 = arith.truncf %199 : vector<2x8x16xf32> to vector<2x8x16xbf16>
    "tpu.trace_start"() <{level = 10 : i32, message = "bqd,bkd->bqk"}> : () -> ()
    %cst_60 = arith.constant dense<0.000000e+00> : vector<2x8x8xf32>
    %204 = tpu.matmul %202, %203, %cst_60 {dimension_numbers = #tpu.dot_dimension_numbers<[2], [2], [1], [1], [0, 0, 0, 1, 1, 1], [0], [0]>} : vector<2x8x16xbf16>, vector<2x8x16xbf16>, vector<2x8x8xf32> -> vector<2x8x8xf32>
    "tpu.trace_stop"() : () -> ()
    %205 = vector.broadcast %0 : vector<2x1x8xf32> to vector<2x8x8xf32>
    %206 = arith.addf %204, %205 : vector<2x8x8xf32>
    %cst_61 = arith.constant dense<0xFF800000> : vector<2x8xf32>
    %207 = vector.multi_reduction <maximumf>, %206, %cst_61 [2] : vector<2x8x8xf32> to vector<2x8xf32>
    %208 = vector.shape_cast %207 : vector<2x8xf32> to vector<2x8x1xf32>
    %209 = vector.broadcast %208 : vector<2x8x1xf32> to vector<2x8x8xf32>
    %210 = arith.subf %206, %209 : vector<2x8x8xf32>
    %211 = math.exp %210 : vector<2x8x8xf32>
    %cst_62 = arith.constant dense<0.000000e+00> : vector<2x8xf32>
    %212 = vector.multi_reduction <add>, %211, %cst_62 [2] : vector<2x8x8xf32> to vector<2x8xf32>
    %213 = vector.shape_cast %212 : vector<2x8xf32> to vector<2x8x1xf32>
    %214 = tpu.reciprocal %213 {approx = true} : vector<2x8x1xf32> -> vector<2x8x1xf32>
    %215 = vector.broadcast %214 : vector<2x8x1xf32> to vector<2x8x8xf32>
    %216 = arith.mulf %211, %215 : vector<2x8x8xf32>
    %217 = arith.truncf %216 : vector<2x8x8xf32> to vector<2x8x8xbf16>
    %218 = arith.truncf %201 : vector<2x8x16xf32> to vector<2x8x16xbf16>
    "tpu.trace_start"() <{level = 10 : i32, message = "bqk,bkd->bqd"}> : () -> ()
    %cst_63 = arith.constant dense<0.000000e+00> : vector<2x8x16xf32>
    %219 = tpu.matmul %217, %218, %cst_63 {dimension_numbers = #tpu.dot_dimension_numbers<[2], [1], [1], [2], [0, 0, 0, 1, 1, 2], [0], [0]>} : vector<2x8x8xbf16>, vector<2x8x16xbf16>, vector<2x8x16xf32> -> vector<2x8x16xf32>
    "tpu.trace_stop"() : () -> ()
    %220 = vector.shape_cast %219 : vector<2x8x16xf32> to vector<16x16xf32>
    %c208 = arith.constant 208 : index
    %c0_64 = arith.constant 0 : index
    %221 = vector.load %arg3[%c208, %c0_64] : memref<864x384xbf16, #tpu.memory_space<vmem>>, vector<16x32xbf16>
    %222 = arith.truncf %220 : vector<16x16xf32> to vector<16x16xbf16>
    %cst_65 = arith.constant dense<0.000000e+00> : vector<16x32xf32>
    %223 = tpu.matmul %222, %221, %cst_65 {dimension_numbers = #tpu.dot_dimension_numbers<[1], [0], [0], [1], [0, 0, 1, 1], [], []>} : vector<16x16xbf16>, vector<16x32xbf16>, vector<16x32xf32> -> vector<16x32xf32>
    %224 = arith.addf %195, %223 : vector<16x32xf32>
    %c11 = arith.constant 11 : index
    %c0_66 = arith.constant 0 : index
    %225 = vector.load %arg2[%c11, %c0_66] : memref<21x384xf32, #tpu.memory_space<vmem>>, vector<1x32xf32>
    %226 = vector.broadcast %225 : vector<1x32xf32> to vector<16x32xf32>
    %227 = arith.addf %224, %226 : vector<16x32xf32>
    %228 = arith.addf %227, %161 : vector<16x32xf32>
    %c12 = arith.constant 12 : index
    %c0_67 = arith.constant 0 : index
    %229 = vector.load %arg2[%c12, %c0_67] : memref<21x384xf32, #tpu.memory_space<vmem>>, vector<1x32xf32>
    %c13 = arith.constant 13 : index
    %c0_68 = arith.constant 0 : index
    %230 = vector.load %arg2[%c13, %c0_68] : memref<21x384xf32, #tpu.memory_space<vmem>>, vector<1x32xf32>
    %cst_69 = arith.constant dense<0.000000e+00> : vector<16xf32>
    %231 = vector.multi_reduction <add>, %228, %cst_69 [1] : vector<16x32xf32> to vector<16xf32>
    %232 = vector.shape_cast %231 : vector<16xf32> to vector<16x1xf32>
    %cst_70 = arith.constant 3.200000e+01 : f32
    %233 = vector.broadcast %cst_70 : f32 to vector<16x1xf32>
    %234 = arith.divf %232, %233 : vector<16x1xf32>
    %235 = vector.broadcast %234 : vector<16x1xf32> to vector<16x32xf32>
    %236 = arith.subf %228, %235 : vector<16x32xf32>
    %237 = arith.mulf %236, %236 : vector<16x32xf32>
    %cst_71 = arith.constant dense<0.000000e+00> : vector<16xf32>
    %238 = vector.multi_reduction <add>, %237, %cst_71 [1] : vector<16x32xf32> to vector<16xf32>
    %239 = vector.shape_cast %238 : vector<16xf32> to vector<16x1xf32>
    %cst_72 = arith.constant 3.200000e+01 : f32
    %240 = vector.broadcast %cst_72 : f32 to vector<16x1xf32>
    %241 = arith.divf %239, %240 : vector<16x1xf32>
    %242 = vector.broadcast %234 : vector<16x1xf32> to vector<16x32xf32>
    %243 = arith.subf %228, %242 : vector<16x32xf32>
    %cst_73 = arith.constant 9.99999974E-6 : f32
    %244 = vector.broadcast %cst_73 : f32 to vector<16x1xf32>
    %245 = arith.addf %241, %244 : vector<16x1xf32>
    %246 = math.rsqrt %245 : vector<16x1xf32>
    %247 = vector.broadcast %246 : vector<16x1xf32> to vector<16x32xf32>
    %248 = arith.mulf %243, %247 : vector<16x32xf32>
    %249 = vector.broadcast %229 : vector<1x32xf32> to vector<16x32xf32>
    %250 = arith.mulf %248, %249 : vector<16x32xf32>
    %251 = vector.broadcast %230 : vector<1x32xf32> to vector<16x32xf32>
    %252 = arith.addf %250, %251 : vector<16x32xf32>
    %253 = arith.truncf %252 : vector<16x32xf32> to vector<16x32xbf16>
    %c224 = arith.constant 224 : index
    %c0_74 = arith.constant 0 : index
    %254 = vector.load %arg3[%c224, %c0_74] : memref<864x384xbf16, #tpu.memory_space<vmem>>, vector<32x64xbf16>
    %cst_75 = arith.constant dense<0.000000e+00> : vector<16x64xf32>
    %255 = tpu.matmul %253, %254, %cst_75 {dimension_numbers = #tpu.dot_dimension_numbers<[1], [0], [0], [1], [0, 0, 1, 1], [], []>} : vector<16x32xbf16>, vector<32x64xbf16>, vector<16x64xf32> -> vector<16x64xf32>
    %c14 = arith.constant 14 : index
    %c0_76 = arith.constant 0 : index
    %256 = vector.load %arg2[%c14, %c0_76] : memref<21x384xf32, #tpu.memory_space<vmem>>, vector<1x64xf32>
    %257 = vector.broadcast %256 : vector<1x64xf32> to vector<16x64xf32>
    %258 = arith.addf %255, %257 : vector<16x64xf32>
    %cst_77 = arith.constant 5.000000e-01 : f32
    %259 = vector.broadcast %cst_77 : f32 to vector<16x64xf32>
    %260 = arith.mulf %259, %258 : vector<16x64xf32>
    %cst_78 = arith.constant 0.707106769 : f32
    %261 = vector.broadcast %cst_78 : f32 to vector<16x64xf32>
    %262 = arith.mulf %258, %261 : vector<16x64xf32>
    %263 = math.erf %262 : vector<16x64xf32>
    %cst_79 = arith.constant 1.000000e+00 : f32
    %264 = vector.broadcast %cst_79 : f32 to vector<16x64xf32>
    %265 = arith.addf %264, %263 : vector<16x64xf32>
    %266 = arith.mulf %260, %265 : vector<16x64xf32>
    %267 = arith.truncf %266 : vector<16x64xf32> to vector<16x64xbf16>
    %c256 = arith.constant 256 : index
    %c0_80 = arith.constant 0 : index
    %268 = vector.load %arg3[%c256, %c0_80] : memref<864x384xbf16, #tpu.memory_space<vmem>>, vector<64x32xbf16>
    %cst_81 = arith.constant dense<0.000000e+00> : vector<16x32xf32>
    %269 = tpu.matmul %267, %268, %cst_81 {dimension_numbers = #tpu.dot_dimension_numbers<[1], [0], [0], [1], [0, 0, 1, 1], [], []>} : vector<16x64xbf16>, vector<64x32xbf16>, vector<16x32xf32> -> vector<16x32xf32>
    %c15 = arith.constant 15 : index
    %c0_82 = arith.constant 0 : index
    %270 = vector.load %arg2[%c15, %c0_82] : memref<21x384xf32, #tpu.memory_space<vmem>>, vector<1x32xf32>
    %271 = vector.broadcast %270 : vector<1x32xf32> to vector<16x32xf32>
    %272 = arith.addf %269, %271 : vector<16x32xf32>
    %273 = arith.addf %272, %252 : vector<16x32xf32>
    %c16 = arith.constant 16 : index
    %c0_83 = arith.constant 0 : index
    %274 = vector.load %arg2[%c16, %c0_83] : memref<21x384xf32, #tpu.memory_space<vmem>>, vector<1x32xf32>
    %c17 = arith.constant 17 : index
    %c0_84 = arith.constant 0 : index
    %275 = vector.load %arg2[%c17, %c0_84] : memref<21x384xf32, #tpu.memory_space<vmem>>, vector<1x32xf32>
    %cst_85 = arith.constant dense<0.000000e+00> : vector<16xf32>
    %276 = vector.multi_reduction <add>, %273, %cst_85 [1] : vector<16x32xf32> to vector<16xf32>
    %277 = vector.shape_cast %276 : vector<16xf32> to vector<16x1xf32>
    %cst_86 = arith.constant 3.200000e+01 : f32
    %278 = vector.broadcast %cst_86 : f32 to vector<16x1xf32>
    %279 = arith.divf %277, %278 : vector<16x1xf32>
    %280 = vector.broadcast %279 : vector<16x1xf32> to vector<16x32xf32>
    %281 = arith.subf %273, %280 : vector<16x32xf32>
    %282 = arith.mulf %281, %281 : vector<16x32xf32>
    %cst_87 = arith.constant dense<0.000000e+00> : vector<16xf32>
    %283 = vector.multi_reduction <add>, %282, %cst_87 [1] : vector<16x32xf32> to vector<16xf32>
    %284 = vector.shape_cast %283 : vector<16xf32> to vector<16x1xf32>
    %cst_88 = arith.constant 3.200000e+01 : f32
    %285 = vector.broadcast %cst_88 : f32 to vector<16x1xf32>
    %286 = arith.divf %284, %285 : vector<16x1xf32>
    %287 = vector.broadcast %279 : vector<16x1xf32> to vector<16x32xf32>
    %288 = arith.subf %273, %287 : vector<16x32xf32>
    %cst_89 = arith.constant 9.99999974E-6 : f32
    %289 = vector.broadcast %cst_89 : f32 to vector<16x1xf32>
    %290 = arith.addf %286, %289 : vector<16x1xf32>
    %291 = math.rsqrt %290 : vector<16x1xf32>
    %292 = vector.broadcast %291 : vector<16x1xf32> to vector<16x32xf32>
    %293 = arith.mulf %288, %292 : vector<16x32xf32>
    %294 = vector.broadcast %274 : vector<1x32xf32> to vector<16x32xf32>
    %295 = arith.mulf %293, %294 : vector<16x32xf32>
    %296 = vector.broadcast %275 : vector<1x32xf32> to vector<16x32xf32>
    %297 = arith.addf %295, %296 : vector<16x32xf32>
    %298 = arith.truncf %297 : vector<16x32xf32> to vector<16x32xbf16>
    %c320 = arith.constant 320 : index
    %c0_90 = arith.constant 0 : index
    %299 = vector.load %arg3[%c320, %c0_90] : memref<864x384xbf16, #tpu.memory_space<vmem>>, vector<32x384xbf16>
    %cst_91 = arith.constant dense<0.000000e+00> : vector<16x384xf32>
    %300 = tpu.matmul %298, %299, %cst_91 {dimension_numbers = #tpu.dot_dimension_numbers<[1], [0], [0], [1], [0, 0, 1, 1], [], []>} : vector<16x32xbf16>, vector<32x384xbf16>, vector<16x384xf32> -> vector<16x384xf32>
    %c18 = arith.constant 18 : index
    %c0_92 = arith.constant 0 : index
    %301 = vector.load %arg2[%c18, %c0_92] : memref<21x384xf32, #tpu.memory_space<vmem>>, vector<1x384xf32>
    %302 = vector.broadcast %301 : vector<1x384xf32> to vector<16x384xf32>
    %303 = arith.addf %300, %302 : vector<16x384xf32>
    %cst_93 = arith.constant 0.000000e+00 : f32
    %304 = vector.broadcast %cst_93 : f32 to vector<16x384xf32>
    %305 = arith.maximumf %303, %304 : vector<16x384xf32>
    %306 = arith.truncf %305 : vector<16x384xf32> to vector<16x384xbf16>
    %c352 = arith.constant 352 : index
    %c0_94 = arith.constant 0 : index
    %307 = vector.load %arg3[%c352, %c0_94] : memref<864x384xbf16, #tpu.memory_space<vmem>>, vector<384x128xbf16>
    %cst_95 = arith.constant dense<0.000000e+00> : vector<16x128xf32>
    %308 = tpu.matmul %306, %307, %cst_95 {dimension_numbers = #tpu.dot_dimension_numbers<[1], [0], [0], [1], [0, 0, 1, 1], [], []>} : vector<16x384xbf16>, vector<384x128xbf16>, vector<16x128xf32> -> vector<16x128xf32>
    %c19 = arith.constant 19 : index
    %c0_96 = arith.constant 0 : index
    %309 = vector.load %arg2[%c19, %c0_96] : memref<21x384xf32, #tpu.memory_space<vmem>>, vector<1x128xf32>
    %310 = vector.broadcast %309 : vector<1x128xf32> to vector<16x128xf32>
    %311 = arith.addf %308, %310 : vector<16x128xf32>
    %cst_97 = arith.constant 0.000000e+00 : f32
    %312 = vector.broadcast %cst_97 : f32 to vector<16x128xf32>
    %313 = arith.maximumf %311, %312 : vector<16x128xf32>
    %314 = arith.truncf %313 : vector<16x128xf32> to vector<16x128xbf16>
    %c736 = arith.constant 736 : index
    %c0_98 = arith.constant 0 : index
    %315 = vector.load %arg3[%c736, %c0_98] : memref<864x384xbf16, #tpu.memory_space<vmem>>, vector<128x128xbf16>
    %cst_99 = arith.constant dense<0.000000e+00> : vector<16x128xf32>
    %316 = tpu.matmul %314, %315, %cst_99 {dimension_numbers = #tpu.dot_dimension_numbers<[1], [0], [0], [1], [0, 0, 1, 1], [], []>} : vector<16x128xbf16>, vector<128x128xbf16>, vector<16x128xf32> -> vector<16x128xf32>
    %c20 = arith.constant 20 : index
    %c0_100 = arith.constant 0 : index
    %317 = vector.load %arg2[%c20, %c0_100] : memref<21x384xf32, #tpu.memory_space<vmem>>, vector<1x128xf32>
    %318 = vector.broadcast %317 : vector<1x128xf32> to vector<16x128xf32>
    %319 = arith.addf %316, %318 : vector<16x128xf32>
    %c0_101 = arith.constant 0 : index
    %c0_102 = arith.constant 0 : index
    %320 = vector.load %arg4[%c0_101, %c0_102] : memref<16x128xf32, #tpu.memory_space<vmem>>, vector<16x128xf32>
    tpu.vector_store %arg4[%c0_101, %c0_102], %319 {strides = array<i32>} : memref<16x128xf32, #tpu.memory_space<vmem>>, vector<16x128xf32>,
    return
  }
}

</mosaic_0001>

<bundles_post_ra>
// kernel: tpu_custom_call.1
= control target key start
LH: loop header
LB: loop body
LE: loop exit
PB: predicated region body
PF: predicated region fallthrough
CT: control target
= control target key end

     0   :  { %9 = vsyncpa [#allocation3], 0  ;;  %s3364_s0 = inlined_call_operand.hbm [shape: f32[16,32], index: 0, kind: input, shape index: {}]   ;;  %s3365_s1 = inlined_call_operand.vmem [shape: f32[2,1,8], index: 1, kind: input, shape index: {}]   ;;  %s3366_s2 = inlined_call_operand.hbm [shape: f32[21,384], index: 2, kind: input, shape index: {}]   ;;  %s3367_s3 = inlined_call_operand.hbm [shape: bf16[864,384], index: 3, kind: input, shape index: {}]   ;;  %s3368_s4 = inlined_call_operand.hbm [shape: f32[16,128], index: 4, kind: output, shape index: {}]  }
   0x1   :  { %10 = vsyncpa [#allocation6], 0 }
   0x2   :  { %11 = vsyncpa [#allocation4], 0  ;;  %s2980_s15 = smov [#allocation5]   ;;  %s2886_s19 = scalar_lea.hbm %s3366_s2, 1152 }
   0x3   :  { %s31_s16 = sshll.u32 %s2980_s15, 4  ;;  %p2887_p0 = scmp.ne.s32.totalorder %s3366_s2, %s2886_s19  ;;  %s32_s16 = int_to_ptr.vmem [resolvable:$true] %s31_s16 }
   0x4   :  { %p2890_p1 = scmp.lt.u32.totalorder %s2886_s19, %s3366_s2 }
   0x6   :  { %p2892_p2 = pnand %p2890_p1, %p2887_p0 }
   0x8   :  { %2895 = shalt.err (!%p2892_p2)
}
   0x9   :  { %s2896_s24 = scalar_lea.vmem %s32_s16, 1152  ;;  %p2901_p4 = scmp.lt.s32.totalorder %s32_s16, %s32_s16 }
   0xa   :  { %p2897_p3 = scmp.ne.s32.totalorder %s32_s16, %s2896_s24  ;;  %p2902_p5 = scmp.lt.s32.totalorder %s2896_s24, %s2896_s24 }
   0xc   :  { %p2903_p6 = por %p2902_p5, %p2901_p4 }
   0xe   :  { %p2904_p7 = pnand %p2903_p6, %p2897_p3 }
  0x10   :  { %2907 = shalt.err (!%p2904_p7)
}
  0x11   :  { %s2981_s25 = smov 384   ;;  %s2982_s26 = smov 24  }
  0x12   :  { %37 = dma.hbm_to_vmem [thread:$0]  %s3366_s2, 1152, %s32_s16, [#allocation6], %s2981_s25, %s2981_s25, %s2982_s26  }
  0x13   :  { %s2983_s29 = smov [#allocation2]   ;;  %s2908_s7 = scalar_lea.hbm %s3364_s0, 256 }
  0x14   :  { %s17_s30 = sshll.u32 %s2983_s29, 4  ;;  %p2909_p8 = scmp.ne.s32.totalorder %s3364_s0, %s2908_s7  ;;  %s18_s30 = int_to_ptr.vmem [resolvable:$true] %s17_s30 }
  0x15   :  { %p2912_p9 = scmp.lt.u32.totalorder %s2908_s7, %s3364_s0 }
  0x17   :  { %p2914_p10 = pnand %p2912_p9, %p2909_p8 }
  0x19   :  { %2917 = shalt.err (!%p2914_p10)
}
  0x1a   :  { %s2918_s12 = scalar_lea.vmem %s18_s30, 256  ;;  %p2923_p12 = scmp.lt.s32.totalorder %s18_s30, %s18_s30 }
  0x1b   :  { %p2919_p11 = scmp.ne.s32.totalorder %s18_s30, %s2918_s12  ;;  %p2924_p13 = scmp.lt.s32.totalorder %s2918_s12, %s2918_s12 }
  0x1d   :  { %p2925_p0 = por %p2924_p13, %p2923_p12 }
  0x1f   :  { %p2926_p1 = pnand %p2925_p0, %p2919_p11 }
  0x21   :  { %2929 = shalt.err (!%p2926_p1)
}
  0x22   :  { %s2984_s2 = smov 128   ;;  %s2985_s13 = smov 8  }
  0x23   :  { %23 = dma.hbm_to_vmem [thread:$0]  %s3364_s0, 256, %s18_s30, [#allocation3], %s2984_s2, %s2984_s2, %s2985_s13  }
  0x24   :  { %s2986_s16 = smov [#allocation7]   ;;  %s2930_s20 = scalar_lea.hbm %s3367_s3, 20736 }
  0x25   :  { %s43_s17 = sshll.u32 %s2986_s16, 4  ;;  %p2931_p2 = scmp.ne.s32.totalorder %s3367_s3, %s2930_s20  ;;  %s44_s17 = int_to_ptr.vmem [resolvable:$true] %s43_s17 }
  0x26   :  { %p2934_p3 = scmp.lt.u32.totalorder %s2930_s20, %s3367_s3 }
  0x28   :  { %p2936_p4 = pnand %p2934_p3, %p2931_p2 }
  0x2a   :  { %2939 = shalt.err (!%p2936_p4)
}
  0x2b   :  { %s2940_s25 = scalar_lea.vmem %s44_s17, 20736  ;;  %p2945_p6 = scmp.lt.s32.totalorder %s44_s17, %s44_s17 }
  0x2c   :  { %p2941_p5 = scmp.ne.s32.totalorder %s44_s17, %s2940_s25  ;;  %p2946_p7 = scmp.lt.s32.totalorder %s2940_s25, %s2940_s25 }
  0x2e   :  { %p2947_p8 = por %p2946_p7, %p2945_p6 }
  0x30   :  { %p2948_p9 = pnand %p2947_p8, %p2941_p5 }
  0x32   :  { %2951 = shalt.err (!%p2948_p9)
}
  0x33   :  { %s2987_s0 = smov 192   ;;  %s2988_s26 = smov 12  }
  0x34   :  { %49 = dma.hbm_to_vmem [thread:$0]  %s3367_s3, 20736, %s44_s17, [#allocation6], %s2987_s0, %s2987_s0, %s2988_s26  }
  0x35   :  { %2974 = dma.done.wait [#allocation3], 256  }
  0x36   :  { %2975 = vsyncadd [#allocation3], 4294967040 }
  0x37   :  { %2976 = dma.done.wait [#allocation6], 21888  }
  0x38   :  { %2977 = vsyncadd [#allocation6], 4294945408  ;;  %vm66_vm0 = vcmask 261120   ;;  %v62_v0 = vld [vmem:[#allocation2] sm:$0xff]  ;;  %v63_v1 = vld [vmem:[#allocation2 + $0x8] sm:$0xff]  ;;  %v2989_v15 = vmov 0.0  }
  0x39   :  { %v67_v2 = vsel %vm66_vm0, %v62_v0, 0.0  ;;  %v70_v3 = vsel %vm66_vm0, %v63_v1, 0.0  ;;  %v2766_v14 = vld [vmem:[#allocation7] ss:$12 sps:$4 sm:$0xff]   ;;  %2524 = vmatprep.subr.bf16.mxu0 %v2989_v15  ;;  %2532 = vmatprep.subr.bf16.mxu1 %v2989_v15  ;;  %v2767_v16 = vld [vmem:[#allocation7 + $0x18] ss:$12 sps:$4 sm:$0xff]  }
  0x3a   :  { %68 = vadd.xlane.f32.xlu0 %v67_v2  ;;  %2525 = vmatpush3.bf16.msra.mxu0 %v2766_v14  ;;  %vm2990_vm1 = vmmov 0   ;;  %v64_v25 = vld [vmem:[#allocation5] ss:$0 sm:$0xff]  ;;  %v65_v29 = vld [vmem:[#allocation5 + $0x1] ss:$0 sm:$0xff]  ;;  %s2991_s3 = smov 96  }
  0x3b   :  { %2528 = vmatprep.mubr.msk.bf16.mxu0 %vm2990_vm1, %v2989_v15  ;;  %2526 = vmatprep.subr.bf16.mxu0 %v2989_v15  ;;  %v103_v34 = vld [vmem:[#allocation5 + $0x2] ss:$0 sm:$0xff]  ;;  %vm177_vm2 = vcmask 130048   ;;  %v3106_v47 = vld [vmem:[%s3365_s1] ss:$0 sm:$0xff]  ;;  %vm273_vm3 = vcmask 64512  }
  0x3c   :  { %2534 = vmatprep.mubr.msk.bf16.mxu1 %vm2990_vm1, %v2989_v15  ;;  %v3111_v49 = vld [vmem:[%s3365_s1 + $0x1] ss:$0 sm:$0xff]  ;;  %s2992_s1 = smov 64   ;;  %s2993_s7 = smov 80   ;;  %vm303_vm4 = vcmask 1043456   ;;  %vm864_vm5 = vcmask 523264  }
  0x3d   :  { %s2994_s8 = smov 112   ;;  %s2995_s9 = smov 48  }
  0x3e   :  { %71 = vadd.xlane.f32.xlu0 %v70_v3  ;;  %2527 = vmatpush3.bf16.msra.mxu0 %v2767_v16  ;;  %s2997_s10 = smov [#allocation8]  }
  0x3f   :  { %2538 = vmatprep.subr.bf16.mxu0 %v2989_v15  ;;  %s2318_s11 = sshll.u32 %s2997_s10, 4  ;;  %s2319_s11 = int_to_ptr.vmem [resolvable:$true] %s2318_s11 }
  0x40   :  { %s2952_s12 = scalar_lea.vmem %s2319_s11, 256  ;;  %p2957_p11 = scmp.lt.s32.totalorder %s2319_s11, %s2319_s11 }
  0x41   :  { %p2953_p10 = scmp.ne.s32.totalorder %s2319_s11, %s2952_s12  ;;  %p2958_p12 = scmp.lt.s32.totalorder %s2952_s12, %s2952_s12 }
  0x43   :  { %p2959_p13 = por %p2958_p12, %p2957_p11 }
  0x45   :  { %p2960_p0 = pnand %p2959_p13, %p2953_p10 }
  0xc7   :  { %v69_v4 = vpop.xlane.xlu0 %68 }
  0xc8   :  { %v74_v5 = vmul.f32 0.03125, %v69_v4 }
  0xca   :  { %v76_v6 = vsub.f32 %v62_v0, %v74_v5 }
  0xcb   :  { %v72_v7 = vpop.xlane.xlu0 %71 }
  0xcc   :  { %v75_v8 = vmul.f32 0.03125, %v72_v7  ;;  %v78_v9 = vmul.f32 %v76_v6, %v76_v6 }
  0xce   :  { %v77_v10 = vsub.f32 %v63_v1, %v75_v8  ;;  %v80_v11 = vsel %vm66_vm0, %v78_v9, 0.0 }
  0xcf   :  { %81 = vadd.xlane.f32.xlu1 %v80_v11 }
  0xd0   :  { %v79_v12 = vmul.f32 %v77_v10, %v77_v10 }
  0xd2   :  { %v83_v13 = vsel %vm66_vm0, %v79_v12, 0.0 }
  0xd3   :  { %84 = vadd.xlane.f32.xlu1 %v83_v13 }
 0x15c   :  { %v82_v17 = vpop.xlane.xlu1 %81 }
 0x15d   :  { %v86_v18 = vmul.f32 0.03125, %v82_v17 }
 0x15f   :  { %v88_v19 = vadd.f32 1e-05, %v86_v18 }
 0x160   :  { %v85_v20 = vpop.xlane.xlu1 %84 }
 0x161   :  { %2826 = vrsqrt.f32 %v88_v19  ;;  %v87_v21 = vmul.f32 0.03125, %v85_v20 }
 0x163   :  { %v89_v22 = vadd.f32 1e-05, %v87_v21 }
 0x165   :  { %2828 = vrsqrt.f32 %v89_v22 }
 0x16b   :  { %v2827_v23 = vpop.eup %2826 }
 0x16c   :  { %v92_v24 = vmul.f32 %v2827_v23, %v76_v6 }
 0x16e   :  { %v94_v28 = vmul.f32 %v92_v24, %v64_v25 }
 0x16f   :  { %v2829_v26 = vpop.eup %2828 }
 0x170   :  { %v93_v27 = vmul.f32 %v2829_v26, %v77_v10  ;;  %v3074_v31 = vadd.f32 %v94_v28, %v65_v29 }
 0x172   :  { %v95_v30 = vmul.f32 %v93_v27, %v64_v25 }
 0x174   :  { %v3076_v32 = vadd.f32 %v95_v30, %v65_v29 }
 0x176   :  { %v98_v33 = vpack.c.bf16 %v3076_v32, %v3074_v31 }
 0x178   :  { %2529 = vmatmul.mubr.msk.bf16.vlgmr.msra.gmra.mrb[0].mxu0 %vm66_vm0, %v98_v33 }
 0x179   :  { %2540 = vmatprep.mubr.msk.bf16.mxu0 %vm2990_vm1, %v2989_v15 }
 0x24b   :  { %v153_v35 = vpop.f32.mrb[0].mxu0 }
 0x24c   :  { %v154_v36 = vadd.f32 %v153_v35, %v103_v34  ;;  %v2530_v37 = vpop.f32.mrb[1].mxu0 }
 0x24d   :  { %v156_v38 = vpop.f32.mrb[2].mxu0 }
 0x24e   :  { %v3083_v39 = vpack.c.bf16 %v154_v36, %v154_v36  ;;  %v157_v40 = vadd.f32 %v156_v38, %v103_v34  ;;  %v2531_v41 = vpop.f32.mrb[3].mxu0 }
 0x250   :  { %v3085_v42 = vpack.c.bf16 %v157_v40, %v157_v40  ;;  %175 = vrot.lane.b32.xlu0 %v3083_v39, %s2991_s3 }
 0x252   :  { %225 = vrot.lane.b32.xlu1 %v3085_v42, %s2991_s3 }
 0x2c2   :  { %v176_v43 = vpop.permute.xlu0 %175 }
 0x2c3   :  { %v182_v44 = vsel %vm177_vm2, %v176_v43, 0 }
 0x2c4   :  { %2533 = vmatpush3.bf16.xpose.msra.mxu1 %v182_v44  ;;  %v226_v45 = vpop.permute.xlu1 %225 }
 0x2c5   :  { %v231_v46 = vsel %vm177_vm2, %v226_v45, 0  ;;  %2544 = vmatprep.subr.bf16.mxu1 %v2989_v15 }
 0x2c6   :  { %2539 = vmatpush3.bf16.xpose.msra.mxu0 %v231_v46 }
 0x2c7   :  { %2550 = vmatprep.subr.bf16.mxu0 %v2989_v15 }
 0x2cb   :  { %2535 = vmatmul.mubr.msk.bf16.vlgmr.msra.gmra.mrb[0].mxu1 %vm177_vm2, %v3083_v39 }
 0x2cc   :  { %2546 = vmatprep.mubr.msk.bf16.mxu1 %vm2990_vm1, %v2989_v15 }
 0x2cd   :  { %2541 = vmatmul.mubr.msk.bf16.vlgmr.msra.gmra.mrb[4].mxu0 %vm177_vm2, %v3085_v42 }
 0x2ce   :  { %2552 = vmatprep.mubr.msk.bf16.mxu0 %vm2990_vm1, %v2989_v15 }
 0x39e   :  { %v218_v48 = vpop.f32.mrb[0].mxu1 }
 0x39f   :  { %v219_v50 = vadd.f32 %v3106_v47, %v218_v48  ;;  %v2536_v51 = vpop.f32.mrb[1].mxu1 }
 0x3a0   :  { %v221_v52 = vpop.f32.mrb[2].mxu1  ;;  %v267_v53 = vpop.f32.mrb[4].mxu0 }
 0x3a1   :  { %v268_v54 = vadd.f32 %v3111_v49, %v267_v53  ;;  %v2537_v55 = vpop.f32.mrb[3].mxu1  ;;  %v2542_v56 = vpop.f32.mrb[5].mxu0  ;;  %v274_v57 = vsel %vm273_vm3, %v219_v50, -inf }
 0x3a2   :  { %v270_v58 = vpop.f32.mrb[6].mxu0  ;;  %275 = vmax.xlane.f32.xlu1 %v274_v57 }
 0x3a3   :  { %v2543_v59 = vpop.f32.mrb[7].mxu0  ;;  %v277_v60 = vsel %vm273_vm3, %v268_v54, -inf }
 0x3a4   :  { %278 = vmax.xlane.f32.xlu0 %v277_v60 }
 0x3b3   :  { %347 = vrot.lane.b32.xlu1 %v3085_v42, %s2992_s1 }
 0x3b7   :  { %400 = vrot.lane.b32.xlu1 %v3083_v39, %s2993_s7 }
 0x42f   :  { %v276_v61 = vpop.xlane.xlu1 %275 }
 0x430   :  { %v280_v62 = vsub.f32 %v219_v50, %v276_v61 }
 0x431   :  { %v279_v63 = vpop.xlane.xlu0 %278 }
 0x432   :  { %v282_v0 = vmul.f32 1.442695, %v280_v62  ;;  %v281_v1 = vsub.f32 %v268_v54, %v279_v63 }
 0x433   :  { %v348_v2 = vpop.permute.xlu1 %347 }
 0x434   :  { %2830 = vpow2.f32 %v282_v0  ;;  %v284_v3 = vmul.f32 1.442695, %v281_v1  ;;  %v353_v4 = vsel %vm303_vm4, %v348_v2, 0 }
 0x435   :  { %2551 = vmatpush3.bf16.msra.mxu0 %v353_v4 }
 0x436   :  { %2832 = vpow2.f32 %v284_v3  ;;  %2562 = vmatprep.subr.bf16.mxu0 %v2989_v15 }
 0x437   :  { %v401_v9 = vpop.permute.xlu1 %400 }
 0x438   :  { %v406_v21 = vsel %vm177_vm2, %v401_v9, 0  ;;  %v2768_v9 = vld [vmem:[#allocation7 + $0x30] ss:$12 sps:$4 sm:$0xff]  }
 0x43e   :  { %v2831_v5 = vpop.eup %2830 }
 0x43f   :  { %v286_v6 = vsel %vm273_vm3, %v2831_v5, 0.0 }
 0x440   :  { %v2833_v7 = vpop.eup %2832  ;;  %287 = vadd.xlane.f32.xlu0 %v286_v6 }
 0x441   :  { %v289_v8 = vsel %vm273_vm3, %v2833_v7, 0.0 }
 0x442   :  { %290 = vadd.xlane.f32.xlu1 %v289_v8 }
 0x453   :  { %450 = vrot.lane.b32.xlu1 %v3085_v42, %s2993_s7 }
 0x456   :  { %298 = vrot.lane.b32.xlu0 %v3083_v39, %s2992_s1 }
 0x457   :  { %448 = vrot.lane.b32.xlu1 %v3085_v42, %s2994_s8 }
 0x45a   :  { %398 = vrot.lane.b32.xlu0 %v3083_v39, %s2994_s8 }
 0x4cd   :  { %v288_v10 = vpop.xlane.xlu0 %287 }
 0x4ce   :  { %2834 = vrcp.f32 %v288_v10  ;;  %v2769_v10 = vld [vmem:[#allocation7 + $0x48] ss:$12 sps:$4 sm:$0xff]  }
 0x4cf   :  { %v291_v11 = vpop.xlane.xlu1 %290 }
 0x4d0   :  { %2836 = vrcp.f32 %v291_v11 }
 0x4d1   :  { %v299_v12 = vpop.permute.xlu0 %298 }
 0x4d2   :  { %v305_v13 = vsel %vm303_vm4, %v299_v12, 0 }
 0x4d3   :  { %2545 = vmatpush3.bf16.msra.mxu1 %v305_v13  ;;  %v451_v20 = vpop.permute.xlu1 %450 }
 0x4d4   :  { %2556 = vmatprep.subr.bf16.mxu1 %v2989_v15  ;;  %v456_v23 = vsel %vm177_vm2, %v451_v20, 0 }
 0x4d5   :  { %v399_v24 = vpop.permute.xlu0 %398 }
 0x4d7   :  { %v449_v25 = vpop.permute.xlu1 %448 }
 0x4d8   :  { %v2835_v14 = vpop.eup %2834 }
 0x4d9   :  { %v294_v16 = vmul.f32 %v2835_v14, %v2831_v5 }
 0x4da   :  { %v2837_v17 = vpop.eup %2836 }
 0x4db   :  { %v295_v18 = vmul.f32 %v2837_v17, %v2833_v7  ;;  %v296_v19 = vpack.c.bf16 %v294_v16, %v294_v16 }
 0x4dd   :  { %2547 = vmatmul.mubr.msk.bf16.vlgmr.msra.gmra.mrb[4].mxu1 %vm273_vm3, %v296_v19  ;;  %v297_v22 = vpack.c.bf16 %v295_v18, %v295_v18 }
 0x4de   :  { %2557 = vmatpush3.bf16.xpose.msra.mxu1 %v406_v21  ;;  %2558 = vmatprep.mubr.msk.bf16.mxu1 %vm2990_vm1, %v2989_v15 }
 0x4df   :  { %2553 = vmatmul.mubr.msk.bf16.vlgmr.msra.gmra.mrb[8].mxu0 %vm273_vm3, %v297_v22  ;;  %2568 = vmatprep.subr.bf16.mxu1 %v2989_v15 }
 0x4e0   :  { %2563 = vmatpush3.bf16.xpose.msra.mxu0 %v456_v23  ;;  %2564 = vmatprep.mubr.msk.bf16.mxu0 %vm2990_vm1, %v2989_v15 }
 0x4e1   :  { %2574 = vmatprep.subr.bf16.mxu0 %v2989_v15 }
 0x4e5   :  { %2559 = vmatmul.mubr.msk.bf16.vlgmr.msra.gmra.mrb[8].mxu1 %vm177_vm2, %v399_v24 }
 0x4e6   :  { %2570 = vmatprep.mubr.msk.bf16.mxu1 %vm2990_vm1, %v2989_v15 }
 0x4e7   :  { %2565 = vmatmul.mubr.msk.bf16.vlgmr.msra.gmra.mrb[12].mxu0 %vm177_vm2, %v449_v25 }
 0x4e8   :  { %2576 = vmatprep.mubr.msk.bf16.mxu0 %vm2990_vm1, %v2989_v15 }
 0x5b0   :  { %v3151_v26 = vpop.f32.mrb[4].mxu1 }
 0x5b1   :  { %v2548_v27 = vpop.f32.mrb[5].mxu1 }
 0x5b2   :  { %v344_v28 = vpop.f32.mrb[6].mxu1  ;;  %v3153_v29 = vpop.f32.mrb[8].mxu0 }
 0x5b3   :  { %v397_v30 = vpack.c.bf16 %v3153_v29, %v3151_v26  ;;  %v2549_v33 = vpop.f32.mrb[7].mxu1  ;;  %v2554_v34 = vpop.f32.mrb[9].mxu0  ;;  %v721_v26 = vld [vmem:[#allocation5 + $0x3] ss:$0 sm:$0xff] }
 0x5b4   :  { %v392_v35 = vpop.f32.mrb[10].mxu0 }
 0x5b5   :  { %v2555_v36 = vpop.f32.mrb[11].mxu0 }
 0x5b8   :  { %v442_v37 = vpop.f32.mrb[8].mxu1 }
 0x5b9   :  { %v443_v38 = vadd.f32 %v3106_v47, %v442_v37  ;;  %v2560_v40 = vpop.f32.mrb[9].mxu1 }
 0x5ba   :  { %v445_v41 = vpop.f32.mrb[10].mxu1  ;;  %v492_v43 = vpop.f32.mrb[12].mxu0 }
 0x5bb   :  { %v493_v44 = vadd.f32 %v3111_v49, %v492_v43  ;;  %v2561_v45 = vpop.f32.mrb[11].mxu1  ;;  %v2566_v46 = vpop.f32.mrb[13].mxu0  ;;  %v498_v48 = vsel %vm273_vm3, %v443_v38, -inf }
 0x5bc   :  { %499 = vmax.xlane.f32.xlu0 %v498_v48  ;;  %v495_v50 = vpop.f32.mrb[14].mxu0 }
 0x5bd   :  { %v2567_v51 = vpop.f32.mrb[15].mxu0  ;;  %v501_v52 = vsel %vm273_vm3, %v493_v44, -inf }
 0x5be   :  { %502 = vmax.xlane.f32.xlu1 %v501_v52 }
 0x5cf   :  { %570 = vrot.lane.b32.xlu1 %v3085_v42, %s2995_s9 }
 0x649   :  { %v500_v53 = vpop.xlane.xlu0 %499 }
 0x64a   :  { %v504_v54 = vsub.f32 %v443_v38, %v500_v53  ;;  %v2770_v53 = vld [vmem:[#allocation7 + $0x60] ss:$12 sps:$4 sm:$0xff]  }
 0x64b   :  { %v503_v55 = vpop.xlane.xlu1 %502 }
 0x64c   :  { %v506_v56 = vmul.f32 1.442695, %v504_v54  ;;  %v505_v57 = vsub.f32 %v493_v44, %v503_v55 }
 0x64e   :  { %2838 = vpow2.f32 %v506_v56  ;;  %v508_v58 = vmul.f32 1.442695, %v505_v57 }
 0x64f   :  { %v571_v59 = vpop.permute.xlu1 %570 }
 0x650   :  { %2840 = vpow2.f32 %v508_v58  ;;  %v576_v60 = vsel %vm303_vm4, %v571_v59, 0 }
 0x651   :  { %2575 = vmatpush3.bf16.msra.mxu0 %v576_v60 }
 0x652   :  { %2586 = vmatprep.subr.bf16.mxu0 %v2989_v15 }
 0x658   :  { %v2839_v61 = vpop.eup %2838 }
 0x659   :  { %v510_v62 = vsel %vm273_vm3, %v2839_v61, 0.0 }
 0x65a   :  { %v2841_v63 = vpop.eup %2840  ;;  %511 = vadd.xlane.f32.xlu0 %v510_v62 }
 0x65b   :  { %v513_v42 = vsel %vm273_vm3, %v2841_v63, 0.0 }
 0x65e   :  { %514 = vadd.xlane.f32.xlu0 %v513_v42 }
 0x674   :  { %522 = vrot.lane.b32.xlu0 %v3083_v39, %s2995_s9 }
 0x6e7   :  { %v512_v0 = vpop.xlane.xlu0 %511 }
 0x6e8   :  { %2842 = vrcp.f32 %v512_v0 }
 0x6eb   :  { %v515_v1 = vpop.xlane.xlu0 %514 }
 0x6ec   :  { %2844 = vrcp.f32 %v515_v1  ;;  %v727_v1 = vld [vmem:[#allocation5 + $0x5] ss:$0 sm:$0xff] }
 0x6ef   :  { %v523_v2 = vpop.permute.xlu0 %522 }
 0x6f0   :  { %v528_v3 = vsel %vm303_vm4, %v523_v2, 0 }
 0x6f1   :  { %2569 = vmatpush3.bf16.msra.mxu1 %v528_v3 }
 0x6f2   :  { %v2843_v4 = vpop.eup %2842  ;;  %2580 = vmatprep.subr.bf16.mxu1 %v2989_v15 }
 0x6f3   :  { %v518_v5 = vmul.f32 %v2843_v4, %v2839_v61  ;;  %v726_v61 = vld [vmem:[#allocation5 + $0x4] ss:$0 sm:$0xff] }
 0x6f5   :  { %v520_v6 = vpack.c.bf16 %v518_v5, %v518_v5 }
 0x6f6   :  { %v2845_v7 = vpop.eup %2844 }
 0x6f7   :  { %v519_v8 = vmul.f32 %v2845_v7, %v2841_v63  ;;  %2571 = vmatmul.mubr.msk.bf16.vlgmr.msra.gmra.mrb[12].mxu1 %vm273_vm3, %v520_v6  ;;  %v2772_v6 = vld [vmem:[#allocation7 + $0x90] ss:$12 sps:$4 sm:$0xff]   ;;  %v2773_v7 = vld [vmem:[#allocation7 + $0xa8] ss:$12 sps:$4 sm:$0xff]  }
 0x6f8   :  { %2582 = vmatprep.mubr.msk.bf16.mxu1 %vm2990_vm1, %v2989_v15  ;;  %2581 = vmatpush3.bf16.msra.mxu1 %v2769_v10 }
 0x6f9   :  { %v521_v39 = vpack.c.bf16 %v519_v8, %v519_v8  ;;  %2592 = vmatprep.subr.bf16.mxu1 %v2989_v15  ;;  %v2774_v8 = vld [vmem:[#allocation7 + $0xc0] ss:$12 sps:$4 sm:$0xff]  }
 0x6fb   :  { %2577 = vmatmul.mubr.msk.bf16.vlgmr.msra.gmra.mrb[16].mxu0 %vm273_vm3, %v521_v39  ;;  %v763_v39 = vld [vmem:[#allocation5 + $0x6] ss:$0 sm:$0xff] }
 0x6fc   :  { %2587 = vmatpush3.bf16.msra.mxu0 %v2768_v9  ;;  %2588 = vmatprep.mubr.msk.bf16.mxu0 %vm2990_vm1, %v2989_v15  ;;  %v2775_v9 = vld [vmem:[#allocation7 + $0xd8] ss:$12 sps:$4 sm:$0xff]  }
 0x6fd   :  { %2626 = vmatprep.subr.bf16.mxu0 %v2989_v15 }
 0x703   :  { %2589 = vmatmul.mubr.msk.bf16.vlgmr.msra.gmra.mrb[20].mxu0 %vm177_vm2, %v397_v30 }
 0x704   :  { %2628 = vmatprep.mubr.msk.bf16.mxu0 %vm2990_vm1, %v2989_v15 }
 0x7ca   :  { %v564_v11 = vpop.f32.mrb[12].mxu1 }
 0x7cb   :  { %v2572_v12 = vpop.f32.mrb[13].mxu1 }
 0x7cc   :  { %v567_v13 = vpop.f32.mrb[14].mxu1 }
 0x7cd   :  { %v2573_v14 = vpop.f32.mrb[15].mxu1 }
 0x7ce   :  { %v612_v16 = vpop.f32.mrb[16].mxu0 }
 0x7cf   :  { %v620_v17 = vpack.c.bf16 %v612_v16, %v564_v11  ;;  %v2578_v18 = vpop.f32.mrb[17].mxu0 }
 0x7d0   :  { %v615_v19 = vpop.f32.mrb[18].mxu0 }
 0x7d1   :  { %v2579_v20 = vpop.f32.mrb[19].mxu0  ;;  %2583 = vmatmul.mubr.msk.bf16.vlgmr.msra.gmra.mrb[16].mxu1 %vm177_vm2, %v620_v17 }
 0x7d2   :  { %2596 = vmatprep.mubr.msk.bf16.mxu1 %vm2990_vm1, %v2989_v15  ;;  %2593 = vmatpush3.bf16.msra.mxu1 %v2770_v53 }
 0x7d3   :  { %2594 = vmatprep.subr.bf16.mxu1 %v2989_v15 }
 0x7d6   :  { %v714_v21 = vpop.f32.mrb[20].mxu0 }
 0x7d7   :  { %v2590_v22 = vpop.f32.mrb[21].mxu0 }
 0x7d8   :  { %v717_v23 = vpop.f32.mrb[22].mxu0 }
 0x7d9   :  { %v2591_v24 = vpop.f32.mrb[23].mxu0 }
 0x8a4   :  { %v664_v25 = vpop.f32.mrb[16].mxu1 }
 0x8a5   :  { %v715_v27 = vadd.f32 %v714_v21, %v664_v25  ;;  %v2584_v28 = vpop.f32.mrb[17].mxu1 }
 0x8a6   :  { %v667_v29 = vpop.f32.mrb[18].mxu1  ;;  %v839_v28 = vld [vmem:[#allocation5 + $0x7] ss:$0 sm:$0xff] }
 0x8a7   :  { %v722_v30 = vadd.f32 %v721_v26, %v715_v27  ;;  %v718_v33 = vadd.f32 %v717_v23, %v667_v29  ;;  %v2585_v34 = vpop.f32.mrb[19].mxu1 }
 0x8a9   :  { %v723_v35 = vadd.f32 %v721_v26, %v718_v33  ;;  %v724_v36 = vadd.f32 %v722_v30, %v3074_v31 }
 0x8ab   :  { %v728_v37 = vsel %vm66_vm0, %v724_v36, 0.0  ;;  %v725_v38 = vadd.f32 %v723_v35, %v3076_v32  ;;  %v2771_v32 = vld [vmem:[#allocation7 + $0x78] ss:$12 sps:$4 sm:$0xff]  }
 0x8ac   :  { %729 = vadd.xlane.f32.xlu1 %v728_v37  ;;  %2595 = vmatpush3.bf16.msra.mxu1 %v2771_v32  ;;  %v2776_v32 = vld [vmem:[#allocation7 + $0xf0] ss:$12 sps:$4 sm:$0xff]  }
 0x8ad   :  { %v731_v40 = vsel %vm66_vm0, %v725_v38, 0.0  ;;  %2600 = vmatprep.subr.bf16.mxu1 %v2989_v15 }
 0x8ae   :  { %732 = vadd.xlane.f32.xlu0 %v731_v40 }
 0x939   :  { %v730_v41 = vpop.xlane.xlu1 %729 }
 0x93a   :  { %v734_v43 = vmul.f32 0.03125, %v730_v41 }
 0x93b   :  { %v733_v44 = vpop.xlane.xlu0 %732 }
 0x93c   :  { %v736_v45 = vsub.f32 %v724_v36, %v734_v43  ;;  %v735_v46 = vmul.f32 0.03125, %v733_v44 }
 0x93e   :  { %v737_v48 = vsub.f32 %v725_v38, %v735_v46  ;;  %v738_v50 = vmul.f32 %v736_v45, %v736_v45 }
 0x940   :  { %v740_v51 = vsel %vm66_vm0, %v738_v50, 0.0  ;;  %v739_v52 = vmul.f32 %v737_v48, %v737_v48 }
 0x941   :  { %741 = vadd.xlane.f32.xlu0 %v740_v51 }
 0x942   :  { %v743_v31 = vsel %vm66_vm0, %v739_v52, 0.0 }
 0x943   :  { %744 = vadd.xlane.f32.xlu1 %v743_v31 }
 0x9ce   :  { %v742_v54 = vpop.xlane.xlu0 %741 }
 0x9cf   :  { %v746_v55 = vmul.f32 0.03125, %v742_v54  ;;  %v2777_v54 = vld [vmem:[#allocation7 + $0x108] ss:$12 sps:$4 sm:$0xff]  }
 0x9d0   :  { %v745_v56 = vpop.xlane.xlu1 %744 }
 0x9d1   :  { %v748_v57 = vadd.f32 1e-05, %v746_v55  ;;  %v747_v58 = vmul.f32 0.03125, %v745_v56 }
 0x9d3   :  { %2846 = vrsqrt.f32 %v748_v57  ;;  %v749_v59 = vadd.f32 1e-05, %v747_v58 }
 0x9d5   :  { %2848 = vrsqrt.f32 %v749_v59 }
 0x9dd   :  { %v2847_v60 = vpop.eup %2846 }
 0x9de   :  { %v752_v62 = vmul.f32 %v2847_v60, %v736_v45 }
 0x9df   :  { %v2849_v63 = vpop.eup %2848 }
 0x9e0   :  { %v754_v42 = vmul.f32 %v752_v62, %v726_v61  ;;  %v753_v0 = vmul.f32 %v2849_v63, %v737_v48  ;;  %v911_v62 = vld [vmem:[#allocation5 + $0x18] ss:$0 sm:$0xff] }
 0x9e2   :  { %v755_v2 = vmul.f32 %v753_v0, %v726_v61  ;;  %v756_v3 = vadd.f32 %v754_v42, %v727_v1 }
 0x9e4   :  { %v757_v4 = vadd.f32 %v755_v2, %v727_v1  ;;  %v912_v2 = vld [vmem:[#allocation5 + $0x19] ss:$0 sm:$0xff] }
 0x9e6   :  { %v758_v5 = vpack.c.bf16 %v757_v4, %v756_v3 }
 0x9e8   :  { %2597 = vmatmul.mubr.msk.bf16.vlgmr.msra.gmra.mrb[20].mxu1 %vm66_vm0, %v758_v5 }
 0x9e9   :  { %2608 = vmatprep.mubr.msk.bf16.mxu1 %vm2990_vm1, %v2989_v15  ;;  %2601 = vmatpush3.bf16.msra.mxu1 %v2772_v6 }
 0x9ea   :  { %2602 = vmatprep.subr.bf16.mxu1 %v2989_v15 }
 0x9ed   :  { %2603 = vmatpush3.bf16.msra.mxu1 %v2773_v7  ;;  %v948_v7 = vld [vmem:[#allocation5 + $0x1a] ss:$0 sm:$0xff] }
 0x9ee   :  { %2604 = vmatprep.subr.bf16.mxu1 %v2989_v15 }
 0x9f1   :  { %2605 = vmatpush3.bf16.msra.mxu1 %v2774_v8 }
 0x9f2   :  { %2606 = vmatprep.subr.bf16.mxu1 %v2989_v15 }
 0x9f5   :  { %2607 = vmatpush3.bf16.msra.mxu1 %v2775_v9 }
 0x9f6   :  { %2612 = vmatprep.subr.bf16.mxu1 %v2989_v15 }
 0xabb   :  { %v813_v10 = vpop.f32.mrb[20].mxu1 }
 0xabc   :  { %v814_v11 = vadd.f32 %v813_v10, %v763_v39  ;;  %v2598_v12 = vpop.f32.mrb[21].mxu1 }
 0xabd   :  { %v816_v13 = vpop.f32.mrb[22].mxu1 }
 0xabe   :  { %v822_v14 = vmul.f32 0.70710677, %v814_v11  ;;  %v817_v16 = vadd.f32 %v816_v13, %v763_v39  ;;  %v2599_v17 = vpop.f32.mrb[23].mxu1  ;;  %v820_v22 = vmul.f32 0.5, %v814_v11 }
 0xac0   :  { %2850 = verf.f32 %v822_v14  ;;  %v823_v18 = vmul.f32 0.70710677, %v817_v16  ;;  %v821_v23 = vmul.f32 0.5, %v817_v16 }
 0xac2   :  { %2852 = verf.f32 %v823_v18 }
 0xaca   :  { %v2851_v19 = vpop.eup %2850 }
 0xacb   :  { %v826_v20 = vadd.f32 1.0, %v2851_v19 }
 0xacc   :  { %v2853_v21 = vpop.eup %2852 }
 0xacd   :  { %v827_v24 = vadd.f32 1.0, %v2853_v21  ;;  %v828_v25 = vmul.f32 %v826_v20, %v820_v22 }
 0xacf   :  { %v829_v26 = vmul.f32 %v827_v24, %v821_v23 }
 0xad1   :  { %v830_v27 = vpack.c.bf16 %v829_v26, %v828_v25 }
 0xad3   :  { %2609 = vmatmul.mubr.msk.bf16.vlgmr.msra.gmra.mrb[24].mxu1 %vm864_vm5, %v830_v27 }
 0xad4   :  { %2616 = vmatprep.mubr.msk.bf16.mxu1 %vm2990_vm1, %v2989_v15  ;;  %2613 = vmatpush3.bf16.msra.mxu1 %v2776_v32 }
 0xad5   :  { %2614 = vmatprep.subr.bf16.mxu1 %v2989_v15 }
 0xad8   :  { %2615 = vmatpush3.bf16.msra.mxu1 %v2777_v54 }
 0xad9   :  { %2620 = vmatprep.subr.bf16.mxu1 %v2989_v15 }
 0xba6   :  { %v902_v29 = vpop.f32.mrb[24].mxu1 }
 0xba7   :  { %v903_v30 = vadd.f32 %v902_v29, %v839_v28  ;;  %v2610_v33 = vpop.f32.mrb[25].mxu1 }
 0xba8   :  { %v905_v34 = vpop.f32.mrb[26].mxu1 }
 0xba9   :  { %v906_v35 = vadd.f32 %v905_v34, %v839_v28  ;;  %v2611_v36 = vpop.f32.mrb[27].mxu1  ;;  %v909_v37 = vadd.f32 %v903_v30, %v756_v3 }
 0xbab   :  { %v913_v38 = vsel %vm66_vm0, %v909_v37, 0.0  ;;  %v910_v40 = vadd.f32 %v906_v35, %v757_v4 }
 0xbac   :  { %914 = vadd.xlane.f32.xlu0 %v913_v38 }
 0xbad   :  { %v916_v41 = vsel %vm66_vm0, %v910_v40, 0.0 }
 0xbae   :  { %917 = vadd.xlane.f32.xlu1 %v916_v41 }
 0xc39   :  { %v915_v43 = vpop.xlane.xlu0 %914 }
 0xc3a   :  { %v919_v44 = vmul.f32 0.03125, %v915_v43 }
 0xc3b   :  { %v918_v45 = vpop.xlane.xlu1 %917 }
 0xc3c   :  { %v921_v46 = vsub.f32 %v909_v37, %v919_v44  ;;  %v920_v48 = vmul.f32 0.03125, %v918_v45 }
 0xc3e   :  { %v922_v50 = vsub.f32 %v910_v40, %v920_v48  ;;  %v923_v51 = vmul.f32 %v921_v46, %v921_v46 }
 0xc40   :  { %v925_v52 = vsel %vm66_vm0, %v923_v51, 0.0  ;;  %v924_v31 = vmul.f32 %v922_v50, %v922_v50 }
 0xc41   :  { %926 = vadd.xlane.f32.xlu0 %v925_v52 }
 0xc42   :  { %v928_v53 = vsel %vm66_vm0, %v924_v31, 0.0 }
 0xc43   :  { %929 = vadd.xlane.f32.xlu1 %v928_v53 }
 0xcce   :  { %v927_v55 = vpop.xlane.xlu0 %926 }
 0xccf   :  { %v931_v56 = vmul.f32 0.03125, %v927_v55 }
 0xcd0   :  { %v930_v57 = vpop.xlane.xlu1 %929 }
 0xcd1   :  { %v933_v58 = vadd.f32 1e-05, %v931_v56  ;;  %v932_v59 = vmul.f32 0.03125, %v930_v57 }
 0xcd3   :  { %2854 = vrsqrt.f32 %v933_v58  ;;  %v934_v60 = vadd.f32 1e-05, %v932_v59 }
 0xcd5   :  { %2856 = vrsqrt.f32 %v934_v60 }
 0xcdd   :  { %v2855_v61 = vpop.eup %2854 }
 0xcde   :  { %v937_v63 = vmul.f32 %v2855_v61, %v921_v46 }
 0xcdf   :  { %v2857_v42 = vpop.eup %2856 }
 0xce0   :  { %v939_v0 = vmul.f32 %v937_v63, %v911_v62  ;;  %v938_v1 = vmul.f32 %v2857_v42, %v922_v50 }
 0xce2   :  { %v940_v3 = vmul.f32 %v938_v1, %v911_v62  ;;  %v3209_v4 = vadd.f32 %v939_v0, %v912_v2 }
 0xce4   :  { %v3211_v5 = vadd.f32 %v940_v3, %v912_v2 }
 0xce6   :  { %v943_v6 = vpack.c.bf16 %v3211_v5, %v3209_v4 }
 0xce8   :  { %2617 = vmatmul.mubr.msk.bf16.vlgmr.msra.gmra.mrb[28].mxu1 %vm66_vm0, %v943_v6 }
 0xce9   :  { %2622 = vmatprep.mubr.msk.bf16.mxu1 %vm2990_vm1, %v2989_v15 }
 0xdbb   :  { %v998_v8 = vpop.f32.mrb[28].mxu1 }
 0xdbc   :  { %v999_v9 = vadd.f32 %v998_v8, %v948_v7  ;;  %v2618_v39 = vpop.f32.mrb[29].mxu1 }
 0xdbd   :  { %v1001_v10 = vpop.f32.mrb[30].mxu1 }
 0xdbe   :  { %v3218_v11 = vpack.c.bf16 %v999_v9, %v999_v9  ;;  %v1002_v12 = vadd.f32 %v1001_v10, %v948_v7  ;;  %v2619_v13 = vpop.f32.mrb[31].mxu1 }
 0xdc0   :  { %v3220_v14 = vpack.c.bf16 %v1002_v12, %v1002_v12  ;;  %1008 = vrot.lane.b32.xlu0 %v3218_v11, %s2991_s3 }
 0xdc2   :  { %1057 = vrot.lane.b32.xlu1 %v3220_v14, %s2991_s3 }
 0xe32   :  { %v1009_v16 = vpop.permute.xlu0 %1008 }
 0xe33   :  { %v1014_v17 = vsel %vm177_vm2, %v1009_v16, 0 }
 0xe34   :  { %2621 = vmatpush3.bf16.xpose.msra.mxu1 %v1014_v17  ;;  %v1058_v18 = vpop.permute.xlu1 %1057 }
 0xe35   :  { %v1063_v19 = vsel %vm177_vm2, %v1058_v18, 0  ;;  %2632 = vmatprep.subr.bf16.mxu1 %v2989_v15 }
 0xe36   :  { %2627 = vmatpush3.bf16.xpose.msra.mxu0 %v1063_v19 }
 0xe37   :  { %2638 = vmatprep.subr.bf16.mxu0 %v2989_v15 }
 0xe3b   :  { %2623 = vmatmul.mubr.msk.bf16.vlgmr.msra.gmra.mrb[32].mxu1 %vm177_vm2, %v3218_v11 }
 0xe3c   :  { %2634 = vmatprep.mubr.msk.bf16.mxu1 %vm2990_vm1, %v2989_v15 }
 0xe3d   :  { %2629 = vmatmul.mubr.msk.bf16.vlgmr.msra.gmra.mrb[24].mxu0 %vm177_vm2, %v3220_v14 }
 0xe3e   :  { %2640 = vmatprep.mubr.msk.bf16.mxu0 %vm2990_vm1, %v2989_v15 }
 0xf0e   :  { %v1050_v20 = vpop.f32.mrb[32].mxu1 }
 0xf0f   :  { %v1051_v21 = vadd.f32 %v3106_v47, %v1050_v20  ;;  %v2624_v22 = vpop.f32.mrb[33].mxu1 }
 0xf10   :  { %v1053_v23 = vpop.f32.mrb[34].mxu1  ;;  %v1099_v24 = vpop.f32.mrb[24].mxu0 }
 0xf11   :  { %v1100_v25 = vadd.f32 %v3111_v49, %v1099_v24  ;;  %v2625_v26 = vpop.f32.mrb[35].mxu1  ;;  %v2630_v27 = vpop.f32.mrb[25].mxu0  ;;  %v1105_v28 = vsel %vm273_vm3, %v1051_v21, -inf }
 0xf12   :  { %1106 = vmax.xlane.f32.xlu1 %v1105_v28  ;;  %v1102_v29 = vpop.f32.mrb[26].mxu0 }
 0xf13   :  { %v2631_v30 = vpop.f32.mrb[27].mxu0  ;;  %v1108_v33 = vsel %vm273_vm3, %v1100_v25, -inf }
 0xf14   :  { %1109 = vmax.xlane.f32.xlu0 %v1108_v33 }
 0xf23   :  { %1177 = vrot.lane.b32.xlu1 %v3220_v14, %s2992_s1 }
 0xf27   :  { %1230 = vrot.lane.b32.xlu1 %v3218_v11, %s2993_s7 }
 0xf9f   :  { %v1107_v34 = vpop.xlane.xlu1 %1106 }
 0xfa0   :  { %v1111_v35 = vsub.f32 %v1051_v21, %v1107_v34 }
 0xfa1   :  { %v1110_v36 = vpop.xlane.xlu0 %1109 }
 0xfa2   :  { %v1113_v37 = vmul.f32 1.442695, %v1111_v35  ;;  %v1112_v38 = vsub.f32 %v1100_v25, %v1110_v36 }
 0xfa3   :  { %v1178_v40 = vpop.permute.xlu1 %1177 }
 0xfa4   :  { %2858 = vpow2.f32 %v1113_v37  ;;  %v1115_v41 = vmul.f32 1.442695, %v1112_v38  ;;  %v1183_v43 = vsel %vm303_vm4, %v1178_v40, 0 }
 0xfa5   :  { %2639 = vmatpush3.bf16.msra.mxu0 %v1183_v43 }
 0xfa6   :  { %2860 = vpow2.f32 %v1115_v41  ;;  %2650 = vmatprep.subr.bf16.mxu0 %v2989_v15 }
 0xfa7   :  { %v1231_v50 = vpop.permute.xlu1 %1230 }
 0xfa8   :  { %v1236_v59 = vsel %vm177_vm2, %v1231_v50, 0 }
 0xfae   :  { %v2859_v44 = vpop.eup %2858 }
 0xfaf   :  { %v1117_v45 = vsel %vm273_vm3, %v2859_v44, 0.0 }
 0xfb0   :  { %v2861_v46 = vpop.eup %2860  ;;  %1118 = vadd.xlane.f32.xlu0 %v1117_v45 }
 0xfb1   :  { %v1120_v48 = vsel %vm273_vm3, %v2861_v46, 0.0 }
 0xfb2   :  { %1121 = vadd.xlane.f32.xlu1 %v1120_v48  ;;  %v2779_v48 = vld [vmem:[#allocation7 + $0x138] ss:$12 sps:$4 sm:$0xff]  }
 0xfc3   :  { %1280 = vrot.lane.b32.xlu1 %v3220_v14, %s2993_s7 }
 0xfc6   :  { %1129 = vrot.lane.b32.xlu0 %v3218_v11, %s2992_s1 }
 0xfc7   :  { %1278 = vrot.lane.b32.xlu1 %v3220_v14, %s2994_s8 }
 0xfca   :  { %1228 = vrot.lane.b32.xlu0 %v3218_v11, %s2994_s8 }
0x103d   :  { %v1119_v51 = vpop.xlane.xlu0 %1118 }
0x103e   :  { %2862 = vrcp.f32 %v1119_v51 }
0x103f   :  { %v1122_v52 = vpop.xlane.xlu1 %1121 }
0x1040   :  { %2864 = vrcp.f32 %v1122_v52 }
0x1041   :  { %v1130_v31 = vpop.permute.xlu0 %1129 }
0x1042   :  { %v1135_v53 = vsel %vm303_vm4, %v1130_v31, 0 }
0x1043   :  { %2633 = vmatpush3.bf16.msra.mxu1 %v1135_v53  ;;  %v1281_v58 = vpop.permute.xlu1 %1280 }
0x1044   :  { %2644 = vmatprep.subr.bf16.mxu1 %v2989_v15  ;;  %v1286_v61 = vsel %vm177_vm2, %v1281_v58, 0 }
0x1045   :  { %v1229_v62 = vpop.permute.xlu0 %1228 }
0x1047   :  { %v1279_v63 = vpop.permute.xlu1 %1278 }
0x1048   :  { %v2863_v32 = vpop.eup %2862 }
0x1049   :  { %v1125_v54 = vmul.f32 %v2863_v32, %v2859_v44 }
0x104a   :  { %v2865_v55 = vpop.eup %2864 }
0x104b   :  { %v1126_v56 = vmul.f32 %v2865_v55, %v2861_v46  ;;  %v1127_v57 = vpack.c.bf16 %v1125_v54, %v1125_v54  ;;  %v2778_v46 = vld [vmem:[#allocation7 + $0x120] ss:$12 sps:$4 sm:$0xff]  }
0x104d   :  { %2635 = vmatmul.mubr.msk.bf16.vlgmr.msra.gmra.mrb[36].mxu1 %vm273_vm3, %v1127_v57  ;;  %v1128_v60 = vpack.c.bf16 %v1126_v56, %v1126_v56 }
0x104e   :  { %2645 = vmatpush3.bf16.xpose.msra.mxu1 %v1236_v59  ;;  %2646 = vmatprep.mubr.msk.bf16.mxu1 %vm2990_vm1, %v2989_v15 }
0x104f   :  { %2641 = vmatmul.mubr.msk.bf16.vlgmr.msra.gmra.mrb[28].mxu0 %vm273_vm3, %v1128_v60  ;;  %2656 = vmatprep.subr.bf16.mxu1 %v2989_v15 }
0x1050   :  { %2651 = vmatpush3.bf16.xpose.msra.mxu0 %v1286_v61  ;;  %2652 = vmatprep.mubr.msk.bf16.mxu0 %vm2990_vm1, %v2989_v15 }
0x1051   :  { %2662 = vmatprep.subr.bf16.mxu0 %v2989_v15 }
0x1055   :  { %2647 = vmatmul.mubr.msk.bf16.vlgmr.msra.gmra.mrb[40].mxu1 %vm177_vm2, %v1229_v62  ;;  %v1551_v62 = vld [vmem:[#allocation5 + $0x1b] ss:$0 sm:$0xff] }
0x1056   :  { %2658 = vmatprep.mubr.msk.bf16.mxu1 %vm2990_vm1, %v2989_v15 }
0x1057   :  { %2653 = vmatmul.mubr.msk.bf16.vlgmr.msra.gmra.mrb[32].mxu0 %vm177_vm2, %v1279_v63 }
0x1058   :  { %2664 = vmatprep.mubr.msk.bf16.mxu0 %vm2990_vm1, %v2989_v15 }
0x1120   :  { %v3276_v42 = vpop.f32.mrb[36].mxu1 }
0x1121   :  { %v2636_v0 = vpop.f32.mrb[37].mxu1 }
0x1122   :  { %v1174_v1 = vpop.f32.mrb[38].mxu1  ;;  %v1219_v2 = vpop.f32.mrb[28].mxu0 }
0x1123   :  { %v1227_v3 = vpack.c.bf16 %v1219_v2, %v3276_v42  ;;  %v2637_v6 = vpop.f32.mrb[39].mxu1  ;;  %v2642_v7 = vpop.f32.mrb[29].mxu0 }
0x1124   :  { %v1222_v8 = vpop.f32.mrb[30].mxu0 }
0x1125   :  { %v2643_v9 = vpop.f32.mrb[31].mxu0 }
0x1128   :  { %v1272_v39 = vpop.f32.mrb[40].mxu1 }
0x1129   :  { %v1273_v10 = vadd.f32 %v3106_v47, %v1272_v39  ;;  %v2648_v12 = vpop.f32.mrb[41].mxu1 }
0x112a   :  { %v1275_v13 = vpop.f32.mrb[42].mxu1  ;;  %v1322_v16 = vpop.f32.mrb[32].mxu0 }
0x112b   :  { %v1323_v17 = vadd.f32 %v3111_v49, %v1322_v16  ;;  %v2649_v18 = vpop.f32.mrb[43].mxu1  ;;  %v2654_v19 = vpop.f32.mrb[33].mxu0  ;;  %v1328_v20 = vsel %vm273_vm3, %v1273_v10, -inf }
0x112c   :  { %1329 = vmax.xlane.f32.xlu0 %v1328_v20  ;;  %v1325_v21 = vpop.f32.mrb[34].mxu0 }
0x112d   :  { %v2655_v22 = vpop.f32.mrb[35].mxu0  ;;  %v1331_v23 = vsel %vm273_vm3, %v1323_v17, -inf }
0x112e   :  { %1332 = vmax.xlane.f32.xlu1 %v1331_v23  ;;  %v2780_v22 = vld [vmem:[#allocation7 + $0x150] ss:$12 sps:$4 sm:$0xff]  }
0x113f   :  { %1400 = vrot.lane.b32.xlu1 %v3220_v14, %s2995_s9 }
0x11b9   :  { %v1330_v24 = vpop.xlane.xlu0 %1329 }
0x11ba   :  { %v1334_v47 = vsub.f32 %v1273_v10, %v1330_v24 }
0x11bb   :  { %v1333_v25 = vpop.xlane.xlu1 %1332 }
0x11bc   :  { %v1336_v26 = vmul.f32 1.442695, %v1334_v47  ;;  %v1335_v27 = vsub.f32 %v1323_v17, %v1333_v25 }
0x11be   :  { %2866 = vpow2.f32 %v1336_v26  ;;  %v1338_v49 = vmul.f32 1.442695, %v1335_v27 }
0x11bf   :  { %v1401_v28 = vpop.permute.xlu1 %1400 }
0x11c0   :  { %2868 = vpow2.f32 %v1338_v49  ;;  %v1406_v29 = vsel %vm303_vm4, %v1401_v28, 0  ;;  %v1556_v28 = vld [vmem:[#allocation5 + $0x1c] ss:$0 sm:$0xff] }
0x11c1   :  { %2663 = vmatpush3.bf16.msra.mxu0 %v1406_v29 }
0x11c2   :  { %2674 = vmatprep.subr.bf16.mxu0 %v2989_v15 }
0x11c8   :  { %v2867_v30 = vpop.eup %2866 }
0x11c9   :  { %v1340_v33 = vsel %vm273_vm3, %v2867_v30, 0.0 }
0x11ca   :  { %v2869_v34 = vpop.eup %2868  ;;  %1341 = vadd.xlane.f32.xlu0 %v1340_v33 }
0x11cb   :  { %v1343_v14 = vsel %vm273_vm3, %v2869_v34, 0.0 }
0x11ce   :  { %1344 = vadd.xlane.f32.xlu0 %v1343_v14  ;;  %v1557_v14 = vld [vmem:[#allocation5 + $0x1d] ss:$0 sm:$0xff] }
0x11e4   :  { %1352 = vrot.lane.b32.xlu0 %v3218_v11, %s2995_s9 }
0x1257   :  { %v1342_v35 = vpop.xlane.xlu0 %1341 }
0x1258   :  { %2870 = vrcp.f32 %v1342_v35 }
0x125b   :  { %v1345_v36 = vpop.xlane.xlu0 %1344 }
0x125c   :  { %2872 = vrcp.f32 %v1345_v36 }
0x125f   :  { %v1353_v37 = vpop.permute.xlu0 %1352 }
0x1260   :  { %v1358_v38 = vsel %vm303_vm4, %v1353_v37, 0 }
0x1261   :  { %2657 = vmatpush3.bf16.msra.mxu1 %v1358_v38 }
0x1262   :  { %v2871_v40 = vpop.eup %2870  ;;  %2668 = vmatprep.subr.bf16.mxu1 %v2989_v15 }
0x1263   :  { %v1348_v41 = vmul.f32 %v2871_v40, %v2867_v30  ;;  %v2782_v40 = vld [vmem:[#allocation7 + $0x180] ss:$12 sps:$4 sm:$0xff]  }
0x1265   :  { %v1350_v43 = vpack.c.bf16 %v1348_v41, %v1348_v41  ;;  %v2783_v41 = vld [vmem:[#allocation7 + $0x198] ss:$12 sps:$4 sm:$0xff]  }
0x1266   :  { %v2873_v44 = vpop.eup %2872 }
0x1267   :  { %v1349_v45 = vmul.f32 %v2873_v44, %v2869_v34  ;;  %2659 = vmatmul.mubr.msk.bf16.vlgmr.msra.gmra.mrb[44].mxu1 %vm273_vm3, %v1350_v43  ;;  %v2784_v43 = vld [vmem:[#allocation7 + $0x1b0] ss:$12 sps:$4 sm:$0xff]   ;;  %v2785_v44 = vld [vmem:[#allocation7 + $0x1c8] ss:$12 sps:$4 sm:$0xff]  }
0x1268   :  { %2670 = vmatprep.mubr.msk.bf16.mxu1 %vm2990_vm1, %v2989_v15  ;;  %2669 = vmatpush3.bf16.msra.mxu1 %v2779_v48 }
0x1269   :  { %v1351_v11 = vpack.c.bf16 %v1349_v45, %v1349_v45  ;;  %2680 = vmatprep.subr.bf16.mxu1 %v2989_v15  ;;  %v1593_v45 = vld [vmem:[#allocation5 + $0x1e] ss:$0 sm:$0xff] }
0x126b   :  { %2665 = vmatmul.mubr.msk.bf16.vlgmr.msra.gmra.mrb[36].mxu0 %vm273_vm3, %v1351_v11 }
0x126c   :  { %2675 = vmatpush3.bf16.msra.mxu0 %v2778_v46  ;;  %2676 = vmatprep.mubr.msk.bf16.mxu0 %vm2990_vm1, %v2989_v15 }
0x126d   :  { %2688 = vmatprep.subr.bf16.mxu0 %v2989_v15 }
0x1273   :  { %2677 = vmatmul.mubr.msk.bf16.vlgmr.msra.gmra.mrb[40].mxu0 %vm177_vm2, %v1227_v3 }
0x1274   :  { %2696 = vmatprep.mubr.msk.bf16.mxu0 %vm2990_vm1, %v2989_v15  ;;  %2689 = vmatpush3.bf16.msra.mxu0 %v2782_v40 }
0x1275   :  { %2690 = vmatprep.subr.bf16.mxu0 %v2989_v15 }
0x1278   :  { %2691 = vmatpush3.bf16.msra.mxu0 %v2783_v41 }
0x1279   :  { %2692 = vmatprep.subr.bf16.mxu0 %v2989_v15 }
0x127c   :  { %2693 = vmatpush3.bf16.msra.mxu0 %v2784_v43 }
0x127d   :  { %2694 = vmatprep.subr.bf16.mxu0 %v2989_v15 }
0x1280   :  { %2695 = vmatpush3.bf16.msra.mxu0 %v2785_v44  ;;  %v1740_v44 = vld [vmem:[#allocation5 + $0x30] ss:$0 sm:$0xff] }
0x133a   :  { %v1394_v50 = vpop.f32.mrb[44].mxu1 }
0x133b   :  { %v2660_v51 = vpop.f32.mrb[45].mxu1 }
0x133c   :  { %v1397_v52 = vpop.f32.mrb[46].mxu1 }
0x133d   :  { %v2661_v31 = vpop.f32.mrb[47].mxu1 }
0x133e   :  { %v1442_v53 = vpop.f32.mrb[36].mxu0 }
0x133f   :  { %v1450_v32 = vpack.c.bf16 %v1442_v53, %v1394_v50  ;;  %v2666_v54 = vpop.f32.mrb[37].mxu0 }
0x1340   :  { %v1445_v55 = vpop.f32.mrb[38].mxu0 }
0x1341   :  { %v2667_v56 = vpop.f32.mrb[39].mxu0  ;;  %2671 = vmatmul.mubr.msk.bf16.vlgmr.msra.gmra.mrb[48].mxu1 %vm177_vm2, %v1450_v32 }
0x1342   :  { %2684 = vmatprep.mubr.msk.bf16.mxu1 %vm2990_vm1, %v2989_v15  ;;  %2681 = vmatpush3.bf16.msra.mxu1 %v2780_v22  ;;  %v2786_v22 = vld [vmem:[#allocation7 + $0x1e0] ss:$12 sps:$4 sm:$0xff]  }
0x1343   :  { %2682 = vmatprep.subr.bf16.mxu1 %v2989_v15 }
0x1346   :  { %v1544_v57 = vpop.f32.mrb[40].mxu0 }
0x1347   :  { %v2678_v58 = vpop.f32.mrb[41].mxu0 }
0x1348   :  { %v1547_v59 = vpop.f32.mrb[42].mxu0 }
0x1349   :  { %v2679_v60 = vpop.f32.mrb[43].mxu0 }
0x1414   :  { %v1494_v61 = vpop.f32.mrb[48].mxu1 }
0x1415   :  { %v1545_v63 = vadd.f32 %v1544_v57, %v1494_v61  ;;  %v2672_v42 = vpop.f32.mrb[49].mxu1 }
0x1416   :  { %v1497_v0 = vpop.f32.mrb[50].mxu1 }
0x1417   :  { %v1552_v1 = vadd.f32 %v1551_v62, %v1545_v63  ;;  %v1548_v2 = vadd.f32 %v1547_v59, %v1497_v0  ;;  %v2673_v3 = vpop.f32.mrb[51].mxu1 }
0x1419   :  { %v1553_v6 = vadd.f32 %v1551_v62, %v1548_v2  ;;  %v1554_v7 = vadd.f32 %v1552_v1, %v3209_v4  ;;  %v1669_v62 = vld [vmem:[#allocation5 + $0x1f] ss:$0 sm:$0xff] }
0x141b   :  { %v1558_v8 = vsel %vm66_vm0, %v1554_v7, 0.0  ;;  %v1555_v9 = vadd.f32 %v1553_v6, %v3211_v5  ;;  %v2781_v5 = vld [vmem:[#allocation7 + $0x168] ss:$12 sps:$4 sm:$0xff]  }
0x141c   :  { %1559 = vadd.xlane.f32.xlu1 %v1558_v8  ;;  %2683 = vmatpush3.bf16.msra.mxu1 %v2781_v5  ;;  %v2789_v5 = vld [vmem:[#allocation7 + $0x1f8] ss:$12 sps:$4 sm:$0xff]  }
0x141d   :  { %v1561_v39 = vsel %vm66_vm0, %v1555_v9, 0.0 }
0x141e   :  { %1562 = vadd.xlane.f32.xlu0 %v1561_v39 }
0x14a9   :  { %v1560_v10 = vpop.xlane.xlu1 %1559 }
0x14aa   :  { %v1564_v12 = vmul.f32 0.03125, %v1560_v10 }
0x14ab   :  { %v1563_v13 = vpop.xlane.xlu0 %1562 }
0x14ac   :  { %v1566_v16 = vsub.f32 %v1554_v7, %v1564_v12  ;;  %v1565_v17 = vmul.f32 0.03125, %v1563_v13 }
0x14ae   :  { %v1567_v18 = vsub.f32 %v1555_v9, %v1565_v17  ;;  %v1568_v19 = vmul.f32 %v1566_v16, %v1566_v16 }
0x14b0   :  { %v1570_v20 = vsel %vm66_vm0, %v1568_v19, 0.0  ;;  %v1569_v21 = vmul.f32 %v1567_v18, %v1567_v18 }
0x14b1   :  { %1571 = vadd.xlane.f32.xlu0 %v1570_v20 }
0x14b2   :  { %v1573_v4 = vsel %vm66_vm0, %v1569_v21, 0.0 }
0x14b3   :  { %1574 = vadd.xlane.f32.xlu1 %v1573_v4  ;;  %v2788_v4 = vld [vmem:[#allocation7 + $0x1e4] ss:$12 sps:$4 sm:$0xff]  }
0x14b4   :  { %1834 = vmatprep.subr.bf16.mxu1 %v2788_v4 }
0x153e   :  { %v1572_v23 = vpop.xlane.xlu0 %1571 }
0x153f   :  { %v1576_v24 = vmul.f32 0.03125, %v1572_v23  ;;  %v2791_v23 = vld [vmem:[#allocation7 + $0x1fc] ss:$12 sps:$4 sm:$0xff]  }
0x1540   :  { %v1575_v47 = vpop.xlane.xlu1 %1574 }
0x1541   :  { %v1578_v25 = vadd.f32 1e-05, %v1576_v24  ;;  %v1577_v26 = vmul.f32 0.03125, %v1575_v47  ;;  %v2996_v24 = vmov 0   ;;  %v2794_v47 = vld [vmem:[#allocation7 + $0x2d0] ss:$12 sps:$4 sm:$0xff]  }
0x1542   :  { %2484 = vmatprep.subr.bf16.mxu0 %v2794_v47 }
0x1543   :  { %2874 = vrsqrt.f32 %v1578_v25  ;;  %v1579_v27 = vadd.f32 1e-05, %v1577_v26  ;;  %v2795_v25 = vld [vmem:[#allocation7 + $0x210] ss:$12 sps:$4 sm:$0xff]   ;;  %v2796_v26 = vld [vmem:[#allocation7 + $0x2e8] ss:$12 sps:$4 sm:$0xff]  }
0x1545   :  { %2876 = vrsqrt.f32 %v1579_v27  ;;  %v2797_v27 = vld [vmem:[#allocation7 + $0x228] ss:$12 sps:$4 sm:$0xff]  }
0x154d   :  { %v2875_v49 = vpop.eup %2874 }
0x154e   :  { %v1582_v29 = vmul.f32 %v2875_v49, %v1566_v16  ;;  %v2799_v49 = vld [vmem:[#allocation7 + $0x300] ss:$12 sps:$4 sm:$0xff]  }
0x154f   :  { %v2877_v30 = vpop.eup %2876 }
0x1550   :  { %v1584_v33 = vmul.f32 %v1582_v29, %v1556_v28  ;;  %v1583_v34 = vmul.f32 %v2877_v30, %v1567_v18  ;;  %v2802_v29 = vld [vmem:[#allocation7 + $0x318] ss:$12 sps:$4 sm:$0xff]  }
0x1551   :  { %v2803_v30 = vld [vmem:[#allocation7 + $0x258] ss:$12 sps:$4 sm:$0xff]  }
0x1552   :  { %v1585_v35 = vmul.f32 %v1583_v34, %v1556_v28  ;;  %v1586_v36 = vadd.f32 %v1584_v33, %v1557_v14  ;;  %v2800_v28 = vld [vmem:[#allocation7 + $0x240] ss:$12 sps:$4 sm:$0xff]   ;;  %v2805_v33 = vld [vmem:[#allocation7 + $0x330] ss:$12 sps:$4 sm:$0xff]  }
0x1553   :  { %v2806_v34 = vld [vmem:[#allocation7 + $0x270] ss:$12 sps:$4 sm:$0xff]  }
0x1554   :  { %v1587_v37 = vadd.f32 %v1585_v35, %v1557_v14  ;;  %v2808_v14 = vld [vmem:[#allocation7 + $0x348] ss:$12 sps:$4 sm:$0xff]  }
0x1556   :  { %v1588_v38 = vpack.c.bf16 %v1587_v37, %v1586_v36 }
0x1558   :  { %2685 = vmatmul.mubr.msk.bf16.vlgmr.msra.gmra.mrb[52].mxu1 %vm66_vm0, %v1588_v38 }
0x1559   :  { %1835 = vmatpush1.bf16.msra.mxu1 %v2786_v22  ;;  %1866 = vmatprep.mubr.bf16.mxu1 %v2996_v24 }
0x155a   :  { %1836 = vmatprep.subr.bf16.mxu1 %v2791_v23 }
0x155d   :  { %1837 = vmatpush1.bf16.msra.mxu1 %v2789_v5 }
0x155e   :  { %2700 = vmatprep.subr.bf16.mxu1 %v2989_v15 }
0x162b   :  { %v1643_v46 = vpop.f32.mrb[52].mxu1 }
0x162c   :  { %v1644_v11 = vadd.f32 %v1643_v46, %v1593_v45  ;;  %v2686_v48 = vpop.f32.mrb[53].mxu1 }
0x162d   :  { %v1646_v50 = vpop.f32.mrb[54].mxu1 }
0x162e   :  { %v1652_v51 = vmul.f32 0.70710677, %v1644_v11  ;;  %v1647_v52 = vadd.f32 %v1646_v50, %v1593_v45  ;;  %v2687_v31 = vpop.f32.mrb[55].mxu1  ;;  %v1650_v56 = vmul.f32 0.5, %v1644_v11  ;;  %v1741_v50 = vld [vmem:[#allocation5 + $0x31] ss:$0 sm:$0xff] }
0x1630   :  { %2878 = verf.f32 %v1652_v51  ;;  %v1653_v53 = vmul.f32 0.70710677, %v1647_v52  ;;  %v1651_v57 = vmul.f32 0.5, %v1647_v52 }
0x1632   :  { %2880 = verf.f32 %v1653_v53  ;;  %v2792_v53 = vld [vmem:[#allocation7 + $0x1e8] ss:$12 sps:$4 sm:$0xff]  }
0x163a   :  { %v2879_v32 = vpop.eup %2878 }
0x163b   :  { %v1656_v54 = vadd.f32 1.0, %v2879_v32 }
0x163c   :  { %v2881_v55 = vpop.eup %2880 }
0x163d   :  { %v1657_v58 = vadd.f32 1.0, %v2881_v55  ;;  %v1658_v59 = vmul.f32 %v1656_v54, %v1650_v56  ;;  %v2793_v54 = vld [vmem:[#allocation7 + $0x200] ss:$12 sps:$4 sm:$0xff]   ;;  %v2798_v55 = vld [vmem:[#allocation7 + $0x390] ss:$12 sps:$4 sm:$0xff]  }
0x163e   :  { %v2801_v56 = vld [vmem:[#allocation7 + $0x3a8] ss:$12 sps:$4 sm:$0xff]  }
0x163f   :  { %v1659_v60 = vmul.f32 %v1657_v58, %v1651_v57  ;;  %v2804_v57 = vld [vmem:[#allocation7 + $0x3c0] ss:$12 sps:$4 sm:$0xff]   ;;  %v2807_v58 = vld [vmem:[#allocation7 + $0x3d8] ss:$12 sps:$4 sm:$0xff]  }
0x1641   :  { %v1660_v61 = vpack.c.bf16 %v1659_v60, %v1658_v59  ;;  %v2809_v59 = vld [vmem:[#allocation7 + $0x288] ss:$12 sps:$4 sm:$0xff]   ;;  %v2810_v60 = vld [vmem:[#allocation7 + $0x3f0] ss:$12 sps:$4 sm:$0xff]  }
0x1643   :  { %2697 = vmatmul.mubr.msk.bf16.vlgmr.msra.gmra.mrb[44].mxu0 %vm864_vm5, %v1660_v61  ;;  %v2811_v61 = vld [vmem:[#allocation7 + $0x360] ss:$12 sps:$4 sm:$0xff]  }
0x1644   :  { %2485 = vmatpush3.bf16.msra.mxu0 %v2795_v25 }
0x1645   :  { %2486 = vmatprep.subr.bf16.mxu0 %v2796_v26 }
0x1648   :  { %2487 = vmatpush3.bf16.msra.mxu0 %v2797_v27 }
0x1649   :  { %2488 = vmatprep.subr.bf16.mxu0 %v2799_v49  ;;  %v2818_v49 = vld [vmem:[#allocation7 + $0x450] ss:$12 sps:$4 sm:$0xff]  }
0x164c   :  { %2489 = vmatpush3.bf16.msra.mxu0 %v2800_v28 }
0x164d   :  { %2490 = vmatprep.subr.bf16.mxu0 %v2802_v29 }
0x1650   :  { %2491 = vmatpush3.bf16.msra.mxu0 %v2803_v30 }
0x1651   :  { %2492 = vmatprep.subr.bf16.mxu0 %v2805_v33 }
0x1654   :  { %2493 = vmatpush3.bf16.msra.mxu0 %v2806_v34 }
0x1655   :  { %2494 = vmatprep.subr.bf16.mxu0 %v2808_v14  ;;  %v2819_v14 = vld [vmem:[#allocation7 + $0x468] ss:$12 sps:$4 sm:$0xff]  }
0x1658   :  { %2495 = vmatpush3.bf16.msra.mxu0 %v2809_v59 }
0x1659   :  { %2496 = vmatprep.subr.bf16.mxu0 %v2811_v61 }
0x1716   :  { %v1731_v63 = vpop.f32.mrb[44].mxu0 }
0x1717   :  { %v1732_v42 = vadd.f32 %v1731_v63, %v1669_v62  ;;  %v2698_v0 = vpop.f32.mrb[45].mxu0  ;;  %v2813_v63 = vld [vmem:[#allocation7 + $0x408] ss:$12 sps:$4 sm:$0xff]  }
0x1718   :  { %v1734_v1 = vpop.f32.mrb[46].mxu0  ;;  %v2815_v0 = vld [vmem:[#allocation7 + $0x2b8] ss:$12 sps:$4 sm:$0xff]  }
0x1719   :  { %v1735_v2 = vadd.f32 %v1734_v1, %v1669_v62  ;;  %v2699_v3 = vpop.f32.mrb[47].mxu0  ;;  %v1738_v6 = vadd.f32 %v1732_v42, %v1586_v36  ;;  %v2812_v62 = vld [vmem:[#allocation7 + $0x2a0] ss:$12 sps:$4 sm:$0xff]   ;;  %v2814_v42 = vld [vmem:[#allocation7 + $0x378] ss:$12 sps:$4 sm:$0xff]  }
0x171a   :  { %2497 = vmatpush3.bf16.msra.mxu0 %v2812_v62  ;;  %v2816_v1 = vld [vmem:[#allocation7 + $0x420] ss:$12 sps:$4 sm:$0xff]   ;;  %v1784_v3 = vlaneseq }
0x171b   :  { %v1742_v7 = vsel %vm66_vm0, %v1738_v6, 0.0  ;;  %v1739_v8 = vadd.f32 %v1735_v2, %v1587_v37  ;;  %2498 = vmatprep.subr.bf16.mxu0 %v2814_v42  ;;  %v2817_v2 = vld [vmem:[#allocation7 + $0x438] ss:$12 sps:$4 sm:$0xff]   ;;  %v2221_v62 = vld [vmem:[#allocation5 + $0x34] ss:$0 sm:$0xff] }
0x171c   :  { %1743 = vadd.xlane.f32.xlu0 %v1742_v7 }
0x171d   :  { %v1745_v9 = vsel %vm66_vm0, %v1739_v8, 0.0 }
0x171e   :  { %1746 = vadd.xlane.f32.xlu1 %v1745_v9  ;;  %2499 = vmatpush3.bf16.msra.mxu0 %v2815_v0 }
0x171f   :  { %2728 = vmatprep.subr.bf16.mxu0 %v2989_v15 }
0x17a9   :  { %v1744_v39 = vpop.xlane.xlu0 %1743 }
0x17aa   :  { %v1748_v10 = vmul.f32 0.03125, %v1744_v39 }
0x17ab   :  { %v1747_v12 = vpop.xlane.xlu1 %1746 }
0x17ac   :  { %v1750_v13 = vsub.f32 %v1738_v6, %v1748_v10  ;;  %v1749_v16 = vmul.f32 0.03125, %v1747_v12  ;;  %v1785_v6 = vshrl.u32 %v1784_v3, 7 }
0x17ae   :  { %v1751_v17 = vsub.f32 %v1739_v8, %v1749_v16  ;;  %v1752_v18 = vmul.f32 %v1750_v13, %v1750_v13  ;;  %v1786_v7 = vsub.s32 0, %v1785_v6  ;;  %v1782_v8 = vld [vmem:[#allocation5 + $0x32] ss:$8 sm:$0x7]  ;;  %v1790_v9 = vsub.s32 1, %v1785_v6 }
0x17b0   :  { %v1754_v19 = vsel %vm66_vm0, %v1752_v18, 0.0  ;;  %v1753_v20 = vmul.f32 %v1751_v17, %v1751_v17  ;;  %v1787_v39 = vrot.slane %v1782_v8, %v1786_v7  ;;  %v1791_v10 = vrot.slane %v1782_v8, %v1790_v9 }
0x17b1   :  { %1755 = vadd.xlane.f32.xlu0 %v1754_v19 }
0x17b2   :  { %v1757_v21 = vsel %vm66_vm0, %v1753_v20, 0.0 }
0x17b3   :  { %1758 = vadd.xlane.f32.xlu1 %v1757_v21 }
0x183e   :  { %v1756_v35 = vpop.xlane.xlu0 %1755 }
0x183f   :  { %v1760_v36 = vmul.f32 0.03125, %v1756_v35 }
0x1840   :  { %v1759_v37 = vpop.xlane.xlu1 %1758 }
0x1841   :  { %v1762_v38 = vadd.f32 1e-05, %v1760_v36  ;;  %v1761_v40 = vmul.f32 0.03125, %v1759_v37 }
0x1843   :  { %2882 = vrsqrt.f32 %v1762_v38  ;;  %v1763_v41 = vadd.f32 1e-05, %v1761_v40  ;;  %v2820_v38 = vld [vmem:[#allocation7 + $0x480] ss:$12 sps:$4 sm:$0xff]   ;;  %v2821_v40 = vld [vmem:[#allocation7 + $0x498] ss:$12 sps:$4 sm:$0xff]  }
0x1845   :  { %2884 = vrsqrt.f32 %v1763_v41  ;;  %v2822_v41 = vld [vmem:[#allocation7 + $0x4b0] ss:$12 sps:$4 sm:$0xff]  }
0x184d   :  { %v2883_v43 = vpop.eup %2882 }
0x184e   :  { %v1766_v45 = vmul.f32 %v2883_v43, %v1750_v13  ;;  %v2823_v43 = vld [vmem:[#allocation7 + $0x4c8] ss:$12 sps:$4 sm:$0xff]  }
0x184f   :  { %v2885_v46 = vpop.eup %2884 }
0x1850   :  { %v1768_v11 = vmul.f32 %v1766_v45, %v1740_v44  ;;  %v1767_v48 = vmul.f32 %v2885_v46, %v1751_v17  ;;  %v1794_v17 = vsub.s32 2, %v1785_v6  ;;  %v2825_v45 = vld [vmem:[#allocation7 + $0x4f8] ss:$12 sps:$4 sm:$0xff]  }
0x1852   :  { %v1769_v51 = vmul.f32 %v1767_v48, %v1740_v44  ;;  %v1770_v52 = vadd.f32 %v1768_v11, %v1741_v50  ;;  %v1795_v23 = vrot.slane %v1782_v8, %v1794_v17  ;;  %v2824_v44 = vld [vmem:[#allocation7 + $0x4e0] ss:$12 sps:$4 sm:$0xff]   ;;  %v1975_v48 = vld [vmem:[#allocation5 + $0x33] ss:$0 sm:$0xff] }
0x1854   :  { %v1771_v31 = vadd.f32 %v1769_v51, %v1741_v50 }
0x1856   :  { %v1772_v32 = vpack.c.bf16 %v1771_v31, %v1770_v52 }
0x1858   :  { %2385 = vmatmul.mubr.msk.bf16.vlgmr.msra.gmra.mrb[56].mxu1 %vm66_vm0, %v1772_v32 }
0x1859   :  { %2701 = vmatpush3.bf16.msra.mxu1 %v2792_v53  ;;  %2704 = vmatprep.mubr.msk.bf16.mxu1 %vm2990_vm1, %v2989_v15 }
0x185a   :  { %2702 = vmatprep.subr.bf16.mxu1 %v2989_v15 }
0x185d   :  { %2703 = vmatpush3.bf16.msra.mxu1 %v2793_v54 }
0x185e   :  { %2708 = vmatprep.subr.bf16.mxu1 %v2989_v15 }
0x1860   :  { %2705 = vmatmul.mubr.msk.bf16.vlgmr.msra.gmra.mrb[60].mxu1 %vm66_vm0, %v1772_v32 }
0x1861   :  { %2709 = vmatpush3.bf16.msra.mxu1 %v2798_v55  ;;  %2724 = vmatprep.mubr.msk.bf16.mxu1 %vm2990_vm1, %v2989_v15 }
0x1862   :  { %2710 = vmatprep.subr.bf16.mxu1 %v2989_v15 }
0x1865   :  { %2711 = vmatpush3.bf16.msra.mxu1 %v2801_v56 }
0x1866   :  { %2712 = vmatprep.subr.bf16.mxu1 %v2989_v15 }
0x1869   :  { %2713 = vmatpush3.bf16.msra.mxu1 %v2804_v57 }
0x186a   :  { %2714 = vmatprep.subr.bf16.mxu1 %v2989_v15 }
0x186d   :  { %2715 = vmatpush3.bf16.msra.mxu1 %v2807_v58 }
0x186e   :  { %2716 = vmatprep.subr.bf16.mxu1 %v2989_v15 }
0x1871   :  { %2717 = vmatpush3.bf16.msra.mxu1 %v2810_v60 }
0x1872   :  { %2718 = vmatprep.subr.bf16.mxu1 %v2989_v15 }
0x1875   :  { %2719 = vmatpush3.bf16.msra.mxu1 %v2813_v63 }
0x1876   :  { %2720 = vmatprep.subr.bf16.mxu1 %v2989_v15 }
0x1879   :  { %2721 = vmatpush3.bf16.msra.mxu1 %v2816_v1 }
0x187a   :  { %2722 = vmatprep.subr.bf16.mxu1 %v2989_v15 }
0x187d   :  { %2723 = vmatpush3.bf16.msra.mxu1 %v2817_v2 }
0x192b   :  { %v1868_v12 = vpop.f32.mrb[56].mxu1 }
0x192c   :  { %v1869_v13 = vadd.f32 %v1868_v12, %v1787_v39  ;;  %v1870_v16 = vpop.f32.mrb[57].mxu1 }
0x192d   :  { %v1871_v18 = vadd.f32 %v1870_v16, %v1791_v10  ;;  %v1872_v19 = vpop.f32.mrb[58].mxu1 }
0x192e   :  { %v1873_v20 = vadd.f32 %v1872_v19, %v1787_v39  ;;  %v1874_v21 = vpop.f32.mrb[59].mxu1  ;;  %v1918_v22 = vmax.f32 %v1869_v13, 0.0 }
0x192f   :  { %v1875_v4 = vadd.f32 %v1874_v21, %v1791_v10  ;;  %v1919_v24 = vmax.f32 %v1871_v18, 0.0 }
0x1930   :  { %v1921_v5 = vmax.f32 %v1873_v20, 0.0 }
0x1931   :  { %v1922_v47 = vmax.f32 %v1875_v4, 0.0 }
0x1932   :  { %v1924_v25 = vpack.c.bf16 %v1921_v5, %v1918_v22 }
0x1933   :  { %v1925_v26 = vpack.c.bf16 %v1922_v47, %v1919_v24  ;;  %v1911_v27 = vpop.f32.mrb[60].mxu1 }
0x1934   :  { %v1912_v28 = vadd.f32 %v1911_v27, %v1795_v23  ;;  %v2706_v29 = vpop.f32.mrb[61].mxu1 }
0x1935   :  { %v1914_v30 = vpop.f32.mrb[62].mxu1  ;;  %2152 = vmatprep.mubr.bf16.mxu0 %v1925_v26 }
0x1936   :  { %v1915_v33 = vadd.f32 %v1914_v30, %v1795_v23  ;;  %v2707_v34 = vpop.f32.mrb[63].mxu1  ;;  %2153 = vmatmul.mubr.bf16.vlgmr.msra.gmra.mrb[48].mxu0 %v1924_v25  ;;  %v1920_v35 = vmax.f32 %v1912_v28, 0.0 }
0x1937   :  { %2729 = vmatpush3.bf16.msra.mxu0 %v2818_v49  ;;  %2744 = vmatprep.mubr.msk.bf16.mxu0 %vm2990_vm1, %v2989_v15 }
0x1938   :  { %v1923_v36 = vmax.f32 %v1915_v33, 0.0  ;;  %2730 = vmatprep.subr.bf16.mxu0 %v2989_v15 }
0x193a   :  { %v1926_v37 = vpack.c.bf16 %v1923_v36, %v1920_v35 }
0x193b   :  { %2731 = vmatpush3.bf16.msra.mxu0 %v2819_v14 }
0x193c   :  { %2725 = vmatmul.mubr.bf16.vlgmr.msra.gmra.mrb[64].mxu1 %v1926_v37  ;;  %2732 = vmatprep.subr.bf16.mxu0 %v2989_v15 }
0x193f   :  { %2733 = vmatpush3.bf16.msra.mxu0 %v2820_v38 }
0x1940   :  { %2734 = vmatprep.subr.bf16.mxu0 %v2989_v15 }
0x1943   :  { %2735 = vmatpush3.bf16.msra.mxu0 %v2821_v40 }
0x1944   :  { %2736 = vmatprep.subr.bf16.mxu0 %v2989_v15 }
0x1947   :  { %2737 = vmatpush3.bf16.msra.mxu0 %v2822_v41 }
0x1948   :  { %2738 = vmatprep.subr.bf16.mxu0 %v2989_v15 }
0x194b   :  { %2739 = vmatpush3.bf16.msra.mxu0 %v2823_v43 }
0x194c   :  { %2740 = vmatprep.subr.bf16.mxu0 %v2989_v15 }
0x194f   :  { %2741 = vmatpush3.bf16.msra.mxu0 %v2824_v44 }
0x1950   :  { %2742 = vmatprep.subr.bf16.mxu0 %v2989_v15 }
0x1953   :  { %2743 = vmatpush3.bf16.msra.mxu0 %v2825_v45 }
0x1a09   :  { %v2500_v46 = vpop.f32.mrb[48].mxu0 }
0x1a0a   :  { %v2501_v11 = vpop.f32.mrb[49].mxu0 }
0x1a0b   :  { %v2502_v50 = vadd.f32 %v2501_v11, %v2500_v46  ;;  %v2503_v51 = vpop.f32.mrb[50].mxu0 }
0x1a0c   :  { %v2504_v52 = vpop.f32.mrb[51].mxu0 }
0x1a0d   :  { %v2505_v31 = vadd.f32 %v2504_v52, %v2503_v51  ;;  %v2155_v53 = vadd.f32 %v2502_v50, %v1975_v48 }
0x1a0f   :  { %v2195_v32 = vpop.f32.mrb[64].mxu1  ;;  %v2158_v54 = vadd.f32 %v2505_v31, %v1975_v48 }
0x1a10   :  { %v2196_v55 = vadd.f32 %v2195_v32, %v2155_v53  ;;  %v2726_v56 = vpop.f32.mrb[65].mxu1 }
0x1a11   :  { %v2198_v57 = vpop.f32.mrb[66].mxu1 }
0x1a12   :  { %v2199_v58 = vadd.f32 %v2198_v57, %v2158_v54  ;;  %v2727_v59 = vpop.f32.mrb[67].mxu1  ;;  %v2202_v60 = vmax.f32 %v2196_v55, 0.0 }
0x1a14   :  { %v2203_v61 = vmax.f32 %v2199_v58, 0.0 }
0x1a16   :  { %v2204_v15 = vpack.c.bf16 %v2203_v61, %v2202_v60 }
0x1a18   :  { %2745 = vmatmul.mubr.bf16.vlgmr.msra.gmra.mrb[52].mxu0 %v2204_v15 }
0x1aeb   :  { %v2304_v63 = vpop.f32.mrb[52].mxu0 }
0x1aec   :  { %v2305_v42 = vadd.f32 %v2304_v63, %v2221_v62  ;;  %v2746_v0 = vpop.f32.mrb[53].mxu0 }
0x1aed   :  { %v2307_v1 = vpop.f32.mrb[54].mxu0 }
0x1aee   :  { %2311 = vst [vmem:[#allocation8] sm:$0xff] %v2305_v42  ;;  %v2308_v2 = vadd.f32 %v2307_v1, %v2221_v62  ;;  %v2747_v3 = vpop.f32.mrb[55].mxu0 }
0x1af0   :  { %2312 = vst [vmem:[#allocation8 + $0x8] sm:$0xff] %v2308_v2 }
0x1af1   :  { %2963 = shalt.err (!%p2960_p0)
}
0x1af2   :  { %s2964_s16 = scalar_lea.hbm %s3368_s4, 256 }
0x1af3   :  { %p2965_p1 = scmp.ne.s32.totalorder %s3368_s4, %s2964_s16  ;;  %p2968_p2 = scmp.lt.u32.totalorder %s2964_s16, %s3368_s4 }
0x1af5   :  { %p2970_p3 = pnand %p2968_p2, %p2965_p1 }
0x1af7   :  { %2973 = shalt.err (!%p2970_p3)
}
0x1af8   :  { %2324 = dma.vmem_to_hbm [thread:$0]  %s2319_s11, 256, %s3368_s4, [#allocation4], %s2984_s2, %s2984_s2, %s2985_s13  }
0x1af9   :  { %2978 = dma.done.wait [#allocation4], 256  }
0x1afa   :  { %2979 = vsyncadd [#allocation4], 4294967040 }
0x1afb   :  { %2328 = vsyncpa [#allocation3], 1 }
0x1afc   :  { %2329 = vsyncpa [#allocation6], 1 }
0x1afd   :  { %2330 = vsyncpa [#allocation4], 1 }

</bundles_post_ra>
